<compile_context>
chip_gen: v6e
topology: v6e:2x2x1
jax: 0.10.0
libtpu: 0.0.40
codegen_flags: <defaults>
</compile_context>

<pallas_src>
import functools

import jax
import jax.numpy as jnp
from jax import lax
from jax.experimental import pallas as pl
from jax.experimental.pallas import tpu as pltpu


def _round_up(x, m):
    return ((x + m - 1) // m) * m


# ----------------------------------------------------------------------------
# Pallas kernel: one grid step == one batch element.
#   x*_ref : (Cp, N)      inputs (batch dim squeezed by the BlockSpec)
#   wA/wB  : (2*Cip, Cp)  stacked folded projections [ones+g ; theta] / [ones+g ; phi]
#   wW     : (Cp, Cip)    folded output projection; column 0 carries the W-bias
#   o*_ref : (Cp, N)
# ----------------------------------------------------------------------------
def _st_attn_kernel(x1_ref, x2_ref, wA_ref, wB_ref, wW_ref, o1_ref, o2_ref, *, cip):
    x1 = x1_ref[...]                       # (Cp, N), f32
    x2 = x2_ref[...]
    wA = wA_ref[...]
    wB = wB_ref[...]
    wW = wW_ref[...]

    # Stacked channel projections: 2 matmuls instead of 4 (better MXU occupancy).
    p1 = jnp.dot(wA, x1, preferred_element_type=jnp.float32)    # (2*Cip, N)
    p2 = jnp.dot(wB, x2, preferred_element_type=jnp.float32)
    g1, th1 = p1[:cip], p1[cip:]           # g(x1) (row 0 = ones), theta(x1)
    g2, ph2 = p2[:cip], p2[cip:]           # g(x2) (row 0 = ones), phi(x2)

    # energy[i, j] = sum_c theta(x1)[c, i] * phi(x2)[c, j]            -> (N, N)
    # Only the small (Cip, N) lhs is (implicitly) transposed, never the N x N.
    energy = lax.dot_general(th1, ph2, (((0,), (0,)), ((), ())),
                             preferred_element_type=jnp.float32)

    # One exp against a single global max: mathematically identical to the two
    # per-axis-max softmaxes (the shift cancels in the normalizations) and
    # still overflow-safe.  One EUP pass over N^2 instead of two.
    m = jnp.max(jnp.max(energy, axis=1, keepdims=True), axis=0, keepdims=True)
    e = jnp.exp(energy - m)                                      # (N, N)

    # ---- y1 = g(x1) @ softmax_i(energy) --------------------------------------
    # The all-ones row 0 of g1 makes colsum[j] = sum_i e[i, j] pop out of the
    # same matmul; the softmax normalization becomes a lane-wise rescale.
    y1u = jnp.dot(g1, e, preferred_element_type=jnp.float32)     # (Cip, N)
    y1s = y1u * pl.reciprocal(y1u[0:1, :], approx=False)         # row 0 -> 1.0

    # ---- y2[c, i] = sum_j g(x2)[c, j] * softmax_j(energy)[i, j] --------------
    # t[i, r] = sum_j e[i, j] * g2[r, j]; only g2 (Cip, N) is transposed, and
    # column 0 (ones row) gives rowsum[i] = sum_j e[i, j] for free.
    t = lax.dot_general(e, g2, (((1,), (1,)), ((), ())),
                        preferred_element_type=jnp.float32)      # (N, Cip)
    y2sT = t * pl.reciprocal(t[:, 0:1], approx=False)            # col 0 -> 1.0

    # Output projection + residual.  Column 0 of wW holds the folded W-bias and
    # multiplies the all-ones row/col of y1s / y2sT, so no bias broadcast-add.
    # Zero-padded rows/cols of wW kill the padded inter-channels.
    d1 = jnp.dot(wW, y1s, preferred_element_type=jnp.float32)    # (Cp, N)
    d2 = lax.dot_general(wW, y2sT, (((1,), (1,)), ((), ())),
                         preferred_element_type=jnp.float32)     # (Cp, N)

    o1_ref[...] = (x1 + d1).astype(o1_ref.dtype)
    o2_ref[...] = (x2 + d2).astype(o2_ref.dtype)


# ----------------------------------------------------------------------------
# Parameter folding (plain JAX glue).  BN is implemented in inference mode.
# ----------------------------------------------------------------------------
def _fold_bn_then_conv(conv_w, conv_b, bn_gamma, bn_beta, bn_mean, bn_var, eps=1e-5):
    """y = Conv1x1(BN(x)) -> eff_w @ x + eff_b."""
    scale = bn_gamma / jnp.sqrt(bn_var + eps)                    # (Cin,)
    eff_w = conv_w * scale[None, :]                              # (Cout, Cin)
    eff_b = conv_b + conv_w @ (bn_beta - bn_mean * scale)        # (Cout,)
    return eff_w, eff_b


def _fold_conv_then_bn(conv_w, conv_b, bn_gamma, bn_beta, bn_mean, bn_var, eps=1e-5):
    """y = BN(Conv1x1(x)) -> eff_w @ x + eff_b."""
    scale = bn_gamma / jnp.sqrt(bn_var + eps)                    # (Cout,)
    eff_w = conv_w * scale[:, None]                              # (Cout, Cin)
    eff_b = (conv_b - bn_mean) * scale + bn_beta                 # (Cout,)
    return eff_w, eff_b


def make_params(key, in_channels, inter_channels=None):
    C = in_channels
    Ci = inter_channels if inter_channels is not None else max(C // 2, 1)
    ks = jax.random.split(key, 16)
    k = iter(ks)

    def conv(kw, kb, cout, cin):
        bound = 1.0 / jnp.sqrt(cin)
        w = jax.random.uniform(kw, (cout, cin), jnp.float32, -bound, bound)
        b = jax.random.uniform(kb, (cout,), jnp.float32, -bound, bound)
        return w, b

    def bn(kg, kb, c):
        gamma = 1.0 + 0.1 * jax.random.normal(kg, (c,), jnp.float32)
        beta = 0.1 * jax.random.normal(kb, (c,), jnp.float32)
        mean = jnp.zeros((c,), jnp.float32)
        var = jnp.ones((c,), jnp.float32)
        return gamma, beta, mean, var

    params = {}
    params["g"] = _fold_bn_then_conv(*conv(next(k), next(k), Ci, C), *bn(next(k), next(k), C))
    params["theta"] = _fold_bn_then_conv(*conv(next(k), next(k), Ci, C), *bn(next(k), next(k), C))
    params["phi"] = _fold_bn_then_conv(*conv(next(k), next(k), Ci, C), *bn(next(k), next(k), C))
    params["W"] = _fold_conv_then_bn(*conv(next(k), next(k), C, Ci), *bn(next(k), next(k), C))
    return params, C, Ci


# ----------------------------------------------------------------------------
# Wrapper calling pallas_call.
# ----------------------------------------------------------------------------
def _vmem_bytes_estimate(Cp, Cip, N):
    f32 = 4
    io_blocks = 4 * 2 * Cp * N * f32                   # 2 in + 2 out, double-buffered
    weights = (2 * (2 * Cip * Cp) + Cp * Cip) * f32
    temps = (2 * N * N + 8 * Cip * N + 2 * N * Cip + 4 * Cp * N) * f32
    return io_blocks + weights + temps


@functools.partial(jax.jit, static_argnames=("pad_to",))
def spatiotemporal_attention(x1, x2, wg, bg, wt, bt, wp, bp, ww, bw, *, pad_to=8):
    B, C, H, Wd = x1.shape
    N = H * Wd
    Ci = wg.shape[0]

    # Channel padding: one extra all-ones input channel folds the projection
    # biases into the weight matmul; one extra all-ones inter-channel row lets
    # the MXU emit col/row sums of exp(energy) and carries the output bias.
    # Both rounded to a multiple of 8 so in-kernel slices are sublane aligned.
    # N = H*W is the lane axis of every block (multiple of 128 here -> dense vst).
    Cp = _round_up(C + 1, pad_to)
    Cip = _round_up(Ci + 1, pad_to)
    bias_col = C                                   # all-ones input channel

    f32 = jnp.float32
    # Stacked, bias-folded projection weights: rows [0:Cip] = ones-row + g,
    # rows [Cip:2*Cip] = theta (wA) / phi (wB).
    wA = jnp.zeros((2 * Cip, Cp), f32)
    wA = wA.at[0, bias_col].set(1.0)
    wA = wA.at[1:Ci + 1, :C].set(wg).at[1:Ci + 1, bias_col].set(bg)
    wA = wA.at[Cip:Cip + Ci, :C].set(wt).at[Cip:Cip + Ci, bias_col].set(bt)

    wB = jnp.zeros((2 * Cip, Cp), f32)
    wB = wB.at[0, bias_col].set(1.0)
    wB = wB.at[1:Ci + 1, :C].set(wg).at[1:Ci + 1, bias_col].set(bg)
    wB = wB.at[Cip:Cip + Ci, :C].set(wp).at[Cip:Cip + Ci, bias_col].set(bp)

    # Output projection: columns 1..Ci match the shifted g rows; column 0 picks
    # up the all-ones row/col of the normalized y's and so carries the W-bias.
    wWp = jnp.zeros((Cp, Cip), f32).at[:C, 1:Ci + 1].set(ww).at[:C, 0].set(bw)

    def pad_x(x):
        xf = x.reshape(B, C, N).astype(f32)
        xf = jnp.pad(xf, ((0, 0), (0, Cp - C), (0, 0)))
        return xf.at[:, bias_col, :].set(1.0)

    x1p = pad_x(x1)
    x2p = pad_x(x2)

    per_batch = pl.BlockSpec((None, Cp, N), lambda b: (b, 0, 0))
    w_proj_spec = pl.BlockSpec((2 * Cip, Cp), lambda b: (0, 0))
    w_out_spec = pl.BlockSpec((Cp, Cip), lambda b: (0, 0))

    vmem_limit = int(min(max(2 * _vmem_bytes_estimate(Cp, Cip, N), 16 * 2**20),
                         64 * 2**20))

    kernel = functools.partial(_st_attn_kernel, cip=Cip)

    o1p, o2p = pl.pallas_call(
        kernel,
        out_shape=(jax.ShapeDtypeStruct((B, Cp, N), x1.dtype),
                   jax.ShapeDtypeStruct((B, Cp, N), x2.dtype)),
        grid_spec=pltpu.PrefetchScalarGridSpec(
            num_scalar_prefetch=0,
            grid=(B,),
            in_specs=[per_batch, per_batch, w_proj_spec, w_proj_spec, w_out_spec],
            out_specs=[per_batch, per_batch],
        ),
        compiler_params=pltpu.CompilerParams(
            dimension_semantics=("parallel",),
            vmem_limit_bytes=vmem_limit),
    )(x1p, x2p, wA, wB, wWp)

    o1 = o1p[:, :C, :].reshape(B, C, H, Wd)
    o2 = o2p[:, :C, :].reshape(B, C, H, Wd)
    return o1, o2


# ----------------------------------------------------------------------------
# Pure-JAX reference (mirrors the PyTorch forward, BN in inference mode).
# Highest matmul precision so the f32 Pallas kernel is checked tightly.
# ----------------------------------------------------------------------------
def reference(x1, x2, wg, bg, wt, bt, wp, bp, ww, bw):
    B, C, H, Wd = x1.shape
    N = H * Wd
    hp = jax.lax.Precision.HIGHEST
    x1f = x1.reshape(B, C, N).astype(jnp.float32)
    x2f = x2.reshape(B, C, N).astype(jnp.float32)

    proj = lambda w, b, x: jnp.einsum("oc,bcn->bon", w, x, precision=hp) + b[None, :, None]
    g1 = proj(wg, bg, x1f)
    g2 = proj(wg, bg, x2f)
    th1 = proj(wt, bt, x1f)
    ph2 = proj(wp, bp, x2f)

    energy = jnp.einsum("bci,bcj->bij", th1, ph2, precision=hp)   # (B, N, N)
    s2s = jax.nn.softmax(energy, axis=-2)                         # softmax over i
    s1s = jax.nn.softmax(jnp.swapaxes(energy, -1, -2), axis=-2)   # softmax over j

    y1 = jnp.einsum("bci,bij->bcj", g1, s2s, precision=hp)
    y2 = jnp.einsum("bcj,bji->bci", g2, s1s, precision=hp)

    Wop = lambda y: jnp.einsum("oc,bcn->bon", ww, y, precision=hp) + bw[None, :, None]
    o1 = x1f + Wop(y1)
    o2 = x2f + Wop(y2)
    return o1.reshape(B, C, H, Wd), o2.reshape(B, C, H, Wd)


if __name__ == "__main__":
    key = jax.random.PRNGKey(0)
    kp, k1, k2 = jax.random.split(key, 3)

    B, C, H, W = 2, 4, 16, 16
    params, _, Ci = make_params(kp, in_channels=C)
    (wg, bg) = params["g"]
    (wt, bt) = params["theta"]
    (wp, bp) = params["phi"]
    (ww, bw) = params["W"]

    x1 = jax.random.normal(k1, (B, C, H, W), jnp.float32)
    x2 = jax.random.normal(k2, (B, C, H, W), jnp.float32)

    o1, o2 = spatiotemporal_attention(x1, x2, wg, bg, wt, bt, wp, bp, ww, bw)
    jax.block_until_ready((o1, o2))

    r1, r2 = reference(x1, x2, wg, bg, wt, bt, wp, bp, ww, bw)
    # Both sides run in (multi-pass) f32 on the MXU; observed error is ~1e-6.
    # 1e-3 leaves margin for MXU pass-decomposition / exp-approximation deltas.
    assert jnp.allclose(o1, r1, atol=1e-3, rtol=1e-3), float(jnp.max(jnp.abs(o1 - r1)))
    assert jnp.allclose(o2, r2, atol=1e-3, rtol=1e-3), float(jnp.max(jnp.abs(o2 - r2)))

    print("KERNEL_OK")
</pallas_src>

<mosaic_0001>
module attributes {stable_mosaic.version = 11 : i64} {
  func.func @_st_attn_kernel(%arg0: i32, %arg1: memref<1x8x256xf32, #tpu.memory_space<vmem>>, %arg2: memref<1x8x256xf32, #tpu.memory_space<vmem>>, %arg3: memref<16x8xf32, #tpu.memory_space<vmem>>, %arg4: memref<16x8xf32, #tpu.memory_space<vmem>>, %arg5: memref<8x8xf32, #tpu.memory_space<vmem>>, %arg6: memref<1x8x256xf32, #tpu.memory_space<vmem>>, %arg7: memref<1x8x256xf32, #tpu.memory_space<vmem>>) attributes {dimension_semantics = [#tpu.dimension_semantics<parallel>], iteration_bounds = array<i64: 2>, scalar_prefetch = 0 : i64, scratch_operands = 0 : i64, tpu.core_type = #tpu.core_type<tc>, window_params = [{transform_indices = @transform_0, window_bounds = array<i64: 1, 8, 256>}, {transform_indices = @transform_1, window_bounds = array<i64: 1, 8, 256>}, {pipeline_mode = #tpu.pipeline_mode<synchronous>, transform_indices = @transform_2, window_bounds = array<i64: 16, 8>}, {pipeline_mode = #tpu.pipeline_mode<synchronous>, transform_indices = @transform_3, window_bounds = array<i64: 16, 8>}, {pipeline_mode = #tpu.pipeline_mode<synchronous>, transform_indices = @transform_4, window_bounds = array<i64: 8, 8>}, {transform_indices = @transform_5, window_bounds = array<i64: 1, 8, 256>}, {transform_indices = @transform_6, window_bounds = array<i64: 1, 8, 256>}]} {
    %c0 = arith.constant 0 : index
    %c0_0 = arith.constant 0 : index
    %c0_1 = arith.constant 0 : index
    %0 = vector.load %arg1[%c0, %c0_0, %c0_1] : memref<1x8x256xf32, #tpu.memory_space<vmem>>, vector<1x8x256xf32>
    %1 = vector.shape_cast %0 : vector<1x8x256xf32> to vector<8x256xf32>
    %c0_2 = arith.constant 0 : index
    %c0_3 = arith.constant 0 : index
    %c0_4 = arith.constant 0 : index
    %2 = vector.load %arg2[%c0_2, %c0_3, %c0_4] : memref<1x8x256xf32, #tpu.memory_space<vmem>>, vector<1x8x256xf32>
    %3 = vector.shape_cast %2 : vector<1x8x256xf32> to vector<8x256xf32>
    %c0_5 = arith.constant 0 : index
    %c0_6 = arith.constant 0 : index
    %4 = vector.load %arg3[%c0_5, %c0_6] : memref<16x8xf32, #tpu.memory_space<vmem>>, vector<16x8xf32>
    %c0_7 = arith.constant 0 : index
    %c0_8 = arith.constant 0 : index
    %5 = vector.load %arg4[%c0_7, %c0_8] : memref<16x8xf32, #tpu.memory_space<vmem>>, vector<16x8xf32>
    %c0_9 = arith.constant 0 : index
    %c0_10 = arith.constant 0 : index
    %6 = vector.load %arg5[%c0_9, %c0_10] : memref<8x8xf32, #tpu.memory_space<vmem>>, vector<8x8xf32>
    %cst = arith.constant dense<0.000000e+00> : vector<16x256xf32>
    %7 = tpu.matmul %4, %1, %cst {dimension_numbers = #tpu.dot_dimension_numbers<[1], [0], [0], [1], [0, 0, 1, 1], [], []>} : vector<16x8xf32>, vector<8x256xf32>, vector<16x256xf32> -> vector<16x256xf32>
    %cst_11 = arith.constant dense<0.000000e+00> : vector<16x256xf32>
    %8 = tpu.matmul %5, %3, %cst_11 {dimension_numbers = #tpu.dot_dimension_numbers<[1], [0], [0], [1], [0, 0, 1, 1], [], []>} : vector<16x8xf32>, vector<8x256xf32>, vector<16x256xf32> -> vector<16x256xf32>
    %9 = vector.extract_strided_slice %7 {offsets = [0, 0], sizes = [8, 256], strides = [1, 1]} : vector<16x256xf32> to vector<8x256xf32>
    %10 = vector.extract_strided_slice %7 {offsets = [8, 0], sizes = [8, 256], strides = [1, 1]} : vector<16x256xf32> to vector<8x256xf32>
    %11 = vector.extract_strided_slice %8 {offsets = [0, 0], sizes = [8, 256], strides = [1, 1]} : vector<16x256xf32> to vector<8x256xf32>
    %12 = vector.extract_strided_slice %8 {offsets = [8, 0], sizes = [8, 256], strides = [1, 1]} : vector<16x256xf32> to vector<8x256xf32>
    %cst_12 = arith.constant dense<0.000000e+00> : vector<256x256xf32>
    %13 = tpu.matmul %10, %12, %cst_12 {dimension_numbers = #tpu.dot_dimension_numbers<[0], [0], [1], [1], [0, 1, 1, 1], [], []>} : vector<8x256xf32>, vector<8x256xf32>, vector<256x256xf32> -> vector<256x256xf32>
    %cst_13 = arith.constant dense<0xFF800000> : vector<256xf32>
    %14 = vector.multi_reduction <maximumf>, %13, %cst_13 [1] : vector<256x256xf32> to vector<256xf32>
    %15 = vector.shape_cast %14 : vector<256xf32> to vector<256x1xf32>
    %cst_14 = arith.constant dense<0xFF800000> : vector<1xf32>
    %16 = vector.multi_reduction <maximumf>, %15, %cst_14 [0] : vector<256x1xf32> to vector<1xf32>
    %17 = vector.shape_cast %16 : vector<1xf32> to vector<1x1xf32>
    %18 = vector.broadcast %17 : vector<1x1xf32> to vector<256x256xf32>
    %19 = arith.subf %13, %18 : vector<256x256xf32>
    %20 = math.exp %19 : vector<256x256xf32>
    %cst_15 = arith.constant dense<0.000000e+00> : vector<8x256xf32>
    %21 = tpu.matmul %9, %20, %cst_15 {dimension_numbers = #tpu.dot_dimension_numbers<[1], [0], [0], [1], [0, 0, 1, 1], [], []>} : vector<8x256xf32>, vector<256x256xf32>, vector<8x256xf32> -> vector<8x256xf32>
    %22 = vector.extract_strided_slice %21 {offsets = [0, 0], sizes = [1, 256], strides = [1, 1]} : vector<8x256xf32> to vector<1x256xf32>
    %23 = tpu.reciprocal %22 : vector<1x256xf32> -> vector<1x256xf32>
    %24 = vector.broadcast %23 : vector<1x256xf32> to vector<8x256xf32>
    %25 = arith.mulf %21, %24 : vector<8x256xf32>
    %cst_16 = arith.constant dense<0.000000e+00> : vector<256x8xf32>
    %26 = tpu.matmul %20, %11, %cst_16 {dimension_numbers = #tpu.dot_dimension_numbers<[1], [1], [0], [0], [0, 0, 1, 0], [], []>} : vector<256x256xf32>, vector<8x256xf32>, vector<256x8xf32> -> vector<256x8xf32>
    %27 = vector.extract_strided_slice %26 {offsets = [0, 0], sizes = [256, 1], strides = [1, 1]} : vector<256x8xf32> to vector<256x1xf32>
    %28 = tpu.reciprocal %27 : vector<256x1xf32> -> vector<256x1xf32>
    %29 = vector.broadcast %28 : vector<256x1xf32> to vector<256x8xf32>
    %30 = arith.mulf %26, %29 : vector<256x8xf32>
    %cst_17 = arith.constant dense<0.000000e+00> : vector<8x256xf32>
    %31 = tpu.matmul %6, %25, %cst_17 {dimension_numbers = #tpu.dot_dimension_numbers<[1], [0], [0], [1], [0, 0, 1, 1], [], []>} : vector<8x8xf32>, vector<8x256xf32>, vector<8x256xf32> -> vector<8x256xf32>
    %cst_18 = arith.constant dense<0.000000e+00> : vector<8x256xf32>
    %32 = tpu.matmul %6, %30, %cst_18 {dimension_numbers = #tpu.dot_dimension_numbers<[1], [1], [0], [0], [0, 0, 1, 0], [], []>} : vector<8x8xf32>, vector<256x8xf32>, vector<8x256xf32> -> vector<8x256xf32>
    %33 = arith.addf %1, %31 : vector<8x256xf32>
    %c0_19 = arith.constant 0 : index
    %c0_20 = arith.constant 0 : index
    %c0_21 = arith.constant 0 : index
    %34 = vector.load %arg6[%c0_19, %c0_20, %c0_21] : memref<1x8x256xf32, #tpu.memory_space<vmem>>, vector<1x8x256xf32>
    %35 = vector.shape_cast %34 : vector<1x8x256xf32> to vector<8x256xf32>
    %36 = vector.shape_cast %33 : vector<8x256xf32> to vector<1x8x256xf32>
    tpu.vector_store %arg6[%c0_19, %c0_20, %c0_21], %36 {strides = array<i32>} : memref<1x8x256xf32, #tpu.memory_space<vmem>>, vector<1x8x256xf32>,
    %37 = arith.addf %3, %32 : vector<8x256xf32>
    %c0_22 = arith.constant 0 : index
    %c0_23 = arith.constant 0 : index
    %c0_24 = arith.constant 0 : index
    %38 = vector.load %arg7[%c0_22, %c0_23, %c0_24] : memref<1x8x256xf32, #tpu.memory_space<vmem>>, vector<1x8x256xf32>
    %39 = vector.shape_cast %38 : vector<1x8x256xf32> to vector<8x256xf32>
    %40 = vector.shape_cast %37 : vector<8x256xf32> to vector<1x8x256xf32>
    tpu.vector_store %arg7[%c0_22, %c0_23, %c0_24], %40 {strides = array<i32>} : memref<1x8x256xf32, #tpu.memory_space<vmem>>, vector<1x8x256xf32>,
    return
  }
  func.func @transform_0(%arg0: i32) -> (i32, i32, i32) {
    %c0_i32 = arith.constant 0 : i32
    %c0_i32_0 = arith.constant 0 : i32
    %c0_i32_1 = arith.constant 0 : i32
    return %arg0, %c0_i32, %c0_i32_0 : i32, i32, i32
  }
  func.func @transform_1(%arg0: i32) -> (i32, i32, i32) {
    %c0_i32 = arith.constant 0 : i32
    %c0_i32_0 = arith.constant 0 : i32
    %c0_i32_1 = arith.constant 0 : i32
    return %arg0, %c0_i32, %c0_i32_0 : i32, i32, i32
  }
  func.func @transform_2(%arg0: i32) -> (i32, i32) {
    %c0_i32 = arith.constant 0 : i32
    %c0_i32_0 = arith.constant 0 : i32
    %c0_i32_1 = arith.constant 0 : i32
    return %c0_i32, %c0_i32_0 : i32, i32
  }
  func.func @transform_3(%arg0: i32) -> (i32, i32) {
    %c0_i32 = arith.constant 0 : i32
    %c0_i32_0 = arith.constant 0 : i32
    %c0_i32_1 = arith.constant 0 : i32
    return %c0_i32, %c0_i32_0 : i32, i32
  }
  func.func @transform_4(%arg0: i32) -> (i32, i32) {
    %c0_i32 = arith.constant 0 : i32
    %c0_i32_0 = arith.constant 0 : i32
    %c0_i32_1 = arith.constant 0 : i32
    return %c0_i32, %c0_i32_0 : i32, i32
  }
  func.func @transform_5(%arg0: i32) -> (i32, i32, i32) {
    %c0_i32 = arith.constant 0 : i32
    %c0_i32_0 = arith.constant 0 : i32
    %c0_i32_1 = arith.constant 0 : i32
    return %arg0, %c0_i32, %c0_i32_0 : i32, i32, i32
  }
  func.func @transform_6(%arg0: i32) -> (i32, i32, i32) {
    %c0_i32 = arith.constant 0 : i32
    %c0_i32_0 = arith.constant 0 : i32
    %c0_i32_1 = arith.constant 0 : i32
    return %arg0, %c0_i32, %c0_i32_0 : i32, i32, i32
  }
}

</mosaic_0001>

<bundles_post_ra>
// kernel: spatiotemporal_attention.1
= control target key start
LH: loop header
LB: loop body
LE: loop exit
PB: predicated region body
PF: predicated region fallthrough
CT: control target
= control target key end

     0   :  { %s2464_s21 = smov 0   ;;  %s3265_s0 = inlined_call_operand.vmem [shape: f32[2,8,256], index: 0, kind: input, shape index: {}]   ;;  %s3266_s1 = inlined_call_operand.vmem [shape: f32[2,8,256], index: 1, kind: input, shape index: {}]   ;;  %s3267_s2 = inlined_call_operand.vmem [shape: f32[16,8], index: 2, kind: input, shape index: {}]   ;;  %s3268_s3 = inlined_call_operand.vmem [shape: f32[16,8], index: 3, kind: input, shape index: {}]   ;;  %s3269_s4 = inlined_call_operand.vmem [shape: f32[8,8], index: 4, kind: input, shape index: {}]   ;;  %s3270_s5 = inlined_call_operand.vmem [shape: f32[2,8,256], index: 5, kind: output, shape index: {0}]   ;;  %s3271_s6 = inlined_call_operand.vmem [shape: f32[2,8,256], index: 6, kind: output, shape index: {1}]  }
   0x1 LB: > { %s2084_s22 = sadd.s32 4294967295, %s2425_s21   ;;  %p2088_p0 = scmp.ge.s32.totalorder %s2425_s21, 1  ;;  %s2425_s21 = sphi %s2464_s21, %s17_s21  }
   0x2   : > { %p225_p1 = scmp.lt.s32.totalorder %s2425_s21, 3 }
   0x4   : > { %p226_p2 = pnand %p2088_p0, %p225_p1 }
   0x6   : > { %229 = sbr.rel (%p226_p2) target bundleno = 1557 (0x615), region = 40 }
   0xb   : > { %p265_p3 = scmp.lt.s32.totalorder %s2084_s22, 1  ;;  %v3272_v0 = vmov 0.0   ;;  %v289_v1 = vld [vmem:[%s3267_s2] sm:$0xff]  ;;  %vm294_vm0 = vcmask 64512   ;;  %v290_v7 = vld [vmem:[%s3267_s2 + $0x8] sm:$0xff] }
   0xc   : > { %365 = vmatprep.mubr.f32.mxu0 %v3272_v0  ;;  %448 = vmatprep.mubr.f32.mxu1 %v3272_v0  ;;  %v291_v2 = vld [vmem:[%s3268_s3] sm:$0xff]  ;;  %v292_v8 = vld [vmem:[%s3268_s3 + $0x8] sm:$0xff] }
   0xd   : > { %s3400_s22 = smov (!%p265_p3, %s2084_s22), 1 }
   0xe   : > { %s2474_s23 = sshll.u32 %s3400_s22, 4 }
   0xf   : > { %s2480_s26 = scalar_lea.vmem %s3265_s0, %s2474_s23  ;;  %s2489_s7 = scalar_lea.vmem %s3266_s1, %s2474_s23 }
  0x10   : > { %v286_v3 = vld [vmem:[%s2480_s26 + $0x8] sm:$0xff]  ;;  %v285_v4 = vld [vmem:[%s2480_s26] sm:$0xff]  ;;  %s279_s18 = scalar_lea.vmem %s3270_s5, %s2474_s23  ;;  %s284_s22 = scalar_lea.vmem %s3271_s6, %s2474_s23 }
  0x11   : > { %v288_v5 = vld [vmem:[%s2489_s7 + $0x8] sm:$0xff]  ;;  %331 = vmatprep.subr.mxu0 %v286_v3  ;;  %v287_v6 = vld [vmem:[%s2489_s7] sm:$0xff] }
  0x12   : > { %414 = vmatprep.subr.mxu1 %v288_v5  ;;  %332 = vmatpush1.msra.mxu0 %v285_v4 }
  0x13   : > { %415 = vmatpush1.msra.mxu1 %v287_v6  ;;  %2097 = vmatmul.mubr.msk.f32.vlgmr.msra.gmra.mxu0 %vm294_vm0, %v289_v1 }
  0x14   : > { %2099 = vmatmul.mubr.msk.f32.vlgmr.msra.gmra.mxu1 %vm294_vm0, %v291_v2  ;;  %371 = vmatprep.mubr.f32.mxu0 %v3272_v0 }
  0x15   : > { %454 = vmatprep.mubr.f32.mxu1 %v3272_v0 }
  0x17   : > { %2098 = vmatmul.mubr.msk.f32.gmra.mxu0 %vm294_vm0, %v290_v7 }
  0x18   : > { %2100 = vmatmul.mubr.msk.f32.gmra.mxu1 %vm294_vm0, %v292_v8  ;;  %685 = vmatprep.mubr.f32.mxu0 %v3272_v0 }
  0xd3   : > { %v2511_v9 = vpop.f32.mrf.mxu0 }
  0xd4   : > { %3314 = vst [vmem:[#allocation2_spill] sm:$0xff] %v2511_v9  ;;  %v450_v10 = vpop.f32.mrf.mxu1 }
  0xd5   : > { %v2513_v11 = vpop.f32.mrf.mxu0 }
  0xd6   : > { %v452_v12 = vpop.f32.mrf.mxu1 }
  0xd7   : > { %1316 = vmatprep.subr.mxu1 %v452_v12  ;;  %v373_v13 = vpop.f32.mrf.mxu0 }
  0xd8   : > { %v456_v14 = vpop.f32.mrf.mxu1  ;;  %1317 = vmatpush1.xpose.msra.mxu1 %v450_v10  ;;  %461 = vxpose.xlu0.b32.start.end [1/1] (short) %v373_v13, 128 }
  0xd9   : > { %v375_v16 = vpop.f32.mrf.mxu0 }
  0xda   : > { %v458_v15 = vpop.f32.mrf.mxu1 }
  0xdb   : > { %651 = vmatprep.subr.mxu0 %v458_v15 }
  0xdc   : > { %652 = vmatpush1.msra.mxu0 %v456_v14 }
 0x115   : > { %493 = vxpose.xlu0.b32.start.end [1/1] (short) %v375_v16, 128 }
 0x154   : > { %v477_v17 = vpop.trf.xlu0 }
 0x155   : > { %2101 = vmatmul.mubr.msk.f32.vlgmr.msra.gmra.mxu0 %vm294_vm0, %v477_v17 }
 0x156   : > { %691 = vmatprep.mubr.f32.mxu0 %v3272_v0 }
 0x158   : > { %v478_v18 = vpop.trf.xlu0 }
 0x159   : > { %2102 = vmatmul.mubr.msk.f32.gmra.mxu0 %vm294_vm0, %v478_v18 }
 0x15a   : > { %697 = vmatprep.mubr.f32.mxu0 %v3272_v0 }
 0x15c   : > { %v479_v19 = vpop.trf.xlu0 }
 0x15d   : > { %2103 = vmatmul.mubr.msk.f32.gmra.mxu0 %vm294_vm0, %v479_v19 }
 0x15e   : > { %703 = vmatprep.mubr.f32.mxu0 %v3272_v0 }
 0x160   : > { %v480_v20 = vpop.trf.xlu0 }
 0x161   : > { %2104 = vmatmul.mubr.msk.f32.gmra.mxu0 %vm294_vm0, %v480_v20 }
 0x162   : > { %709 = vmatprep.mubr.f32.mxu0 %v3272_v0 }
 0x164   : > { %v481_v21 = vpop.trf.xlu0 }
 0x165   : > { %2105 = vmatmul.mubr.msk.f32.gmra.mxu0 %vm294_vm0, %v481_v21 }
 0x166   : > { %715 = vmatprep.mubr.f32.mxu0 %v3272_v0 }
 0x168   : > { %v482_v22 = vpop.trf.xlu0 }
 0x169   : > { %2106 = vmatmul.mubr.msk.f32.gmra.mxu0 %vm294_vm0, %v482_v22 }
 0x16a   : > { %721 = vmatprep.mubr.f32.mxu0 %v3272_v0 }
 0x16c   : > { %v483_v23 = vpop.trf.xlu0 }
 0x16d   : > { %2107 = vmatmul.mubr.msk.f32.gmra.mxu0 %vm294_vm0, %v483_v23 }
 0x16e   : > { %727 = vmatprep.mubr.f32.mxu0 %v3272_v0 }
 0x170   : > { %v484_v24 = vpop.trf.xlu0 }
 0x171   : > { %2108 = vmatmul.mubr.msk.f32.gmra.mxu0 %vm294_vm0, %v484_v24 }
 0x172   : > { %733 = vmatprep.mubr.f32.mxu0 %v3272_v0 }
 0x174   : > { %v485_v25 = vpop.trf.xlu0 }
 0x175   : > { %2109 = vmatmul.mubr.msk.f32.gmra.mxu0 %vm294_vm0, %v485_v25 }
 0x176   : > { %739 = vmatprep.mubr.f32.mxu0 %v3272_v0 }
 0x178   : > { %v486_v26 = vpop.trf.xlu0 }
 0x179   : > { %2110 = vmatmul.mubr.msk.f32.gmra.mxu0 %vm294_vm0, %v486_v26 }
 0x17a   : > { %745 = vmatprep.mubr.f32.mxu0 %v3272_v0 }
 0x17c   : > { %v487_v27 = vpop.trf.xlu0 }
 0x17d   : > { %2111 = vmatmul.mubr.msk.f32.gmra.mxu0 %vm294_vm0, %v487_v27 }
 0x17e   : > { %751 = vmatprep.mubr.f32.mxu0 %v3272_v0 }
 0x180   : > { %v488_v28 = vpop.trf.xlu0 }
 0x181   : > { %2112 = vmatmul.mubr.msk.f32.gmra.mxu0 %vm294_vm0, %v488_v28 }
 0x182   : > { %757 = vmatprep.mubr.f32.mxu0 %v3272_v0 }
 0x184   : > { %v489_v29 = vpop.trf.xlu0 }
 0x185   : > { %2113 = vmatmul.mubr.msk.f32.gmra.mxu0 %vm294_vm0, %v489_v29 }
 0x186   : > { %763 = vmatprep.mubr.f32.mxu0 %v3272_v0 }
 0x188   : > { %v490_v30 = vpop.trf.xlu0 }
 0x189   : > { %2114 = vmatmul.mubr.msk.f32.gmra.mxu0 %vm294_vm0, %v490_v30 }
 0x18a   : > { %769 = vmatprep.mubr.f32.mxu0 %v3272_v0 }
 0x18c   : > { %v491_v31 = vpop.trf.xlu0 }
 0x18d   : > { %2115 = vmatmul.mubr.msk.f32.gmra.mxu0 %vm294_vm0, %v491_v31 }
 0x18e   : > { %775 = vmatprep.mubr.f32.mxu0 %v3272_v0 }
 0x190   : > { %v492_v32 = vpop.trf.xlu0 }
 0x191   : > { %2116 = vmatmul.mubr.msk.f32.gmra.mxu0 %vm294_vm0, %v492_v32 }
 0x192   : > { %781 = vmatprep.mubr.f32.mxu0 %v3272_v0 }
 0x194   : > { %v509_v33 = vpop.trf.xlu0 }
 0x195   : > { %2117 = vmatmul.mubr.msk.f32.gmra.mxu0 %vm294_vm0, %v509_v33 }
 0x196   : > { %787 = vmatprep.mubr.f32.mxu0 %v3272_v0 }
 0x198   : > { %v510_v34 = vpop.trf.xlu0 }
 0x199   : > { %2118 = vmatmul.mubr.msk.f32.gmra.mxu0 %vm294_vm0, %v510_v34 }
 0x19a   : > { %793 = vmatprep.mubr.f32.mxu0 %v3272_v0 }
 0x19c   : > { %v511_v35 = vpop.trf.xlu0 }
 0x19d   : > { %2119 = vmatmul.mubr.msk.f32.gmra.mxu0 %vm294_vm0, %v511_v35 }
 0x19e   : > { %799 = vmatprep.mubr.f32.mxu0 %v3272_v0 }
 0x1a0   : > { %v512_v36 = vpop.trf.xlu0 }
 0x1a1   : > { %2120 = vmatmul.mubr.msk.f32.gmra.mxu0 %vm294_vm0, %v512_v36 }
 0x1a2   : > { %805 = vmatprep.mubr.f32.mxu0 %v3272_v0 }
 0x1a4   : > { %v513_v37 = vpop.trf.xlu0 }
 0x1a5   : > { %2121 = vmatmul.mubr.msk.f32.gmra.mxu0 %vm294_vm0, %v513_v37 }
 0x1a6   : > { %811 = vmatprep.mubr.f32.mxu0 %v3272_v0 }
 0x1a8   : > { %v514_v38 = vpop.trf.xlu0 }
 0x1a9   : > { %2122 = vmatmul.mubr.msk.f32.gmra.mxu0 %vm294_vm0, %v514_v38 }
 0x1aa   : > { %817 = vmatprep.mubr.f32.mxu0 %v3272_v0 }
 0x1ac   : > { %v515_v39 = vpop.trf.xlu0 }
 0x1ad   : > { %2123 = vmatmul.mubr.msk.f32.gmra.mxu0 %vm294_vm0, %v515_v39 }
 0x1ae   : > { %823 = vmatprep.mubr.f32.mxu0 %v3272_v0 }
 0x1b0   : > { %v516_v40 = vpop.trf.xlu0 }
 0x1b1   : > { %2124 = vmatmul.mubr.msk.f32.gmra.mxu0 %vm294_vm0, %v516_v40 }
 0x1b2   : > { %829 = vmatprep.mubr.f32.mxu0 %v3272_v0 }
 0x1b4   : > { %v517_v41 = vpop.trf.xlu0 }
 0x1b5   : > { %2125 = vmatmul.mubr.msk.f32.gmra.mxu0 %vm294_vm0, %v517_v41 }
 0x1b6   : > { %835 = vmatprep.mubr.f32.mxu0 %v3272_v0 }
 0x1b8   : > { %v518_v42 = vpop.trf.xlu0 }
 0x1b9   : > { %2126 = vmatmul.mubr.msk.f32.gmra.mxu0 %vm294_vm0, %v518_v42 }
 0x1ba   : > { %841 = vmatprep.mubr.f32.mxu0 %v3272_v0 }
 0x1bc   : > { %v519_v43 = vpop.trf.xlu0 }
 0x1bd   : > { %2127 = vmatmul.mubr.msk.f32.gmra.mxu0 %vm294_vm0, %v519_v43 }
 0x1be   : > { %847 = vmatprep.mubr.f32.mxu0 %v3272_v0 }
 0x1c0   : > { %v520_v44 = vpop.trf.xlu0 }
 0x1c1   : > { %2128 = vmatmul.mubr.msk.f32.gmra.mxu0 %vm294_vm0, %v520_v44 }
 0x1c2   : > { %853 = vmatprep.mubr.f32.mxu0 %v3272_v0 }
 0x1c4   : > { %v521_v45 = vpop.trf.xlu0 }
 0x1c5   : > { %2129 = vmatmul.mubr.msk.f32.gmra.mxu0 %vm294_vm0, %v521_v45 }
 0x1c6   : > { %859 = vmatprep.mubr.f32.mxu0 %v3272_v0 }
 0x1c8   : > { %v522_v46 = vpop.trf.xlu0 }
 0x1c9   : > { %2130 = vmatmul.mubr.msk.f32.gmra.mxu0 %vm294_vm0, %v522_v46 }
 0x1ca   : > { %865 = vmatprep.mubr.f32.mxu0 %v3272_v0 }
 0x1cc   : > { %v523_v47 = vpop.trf.xlu0 }
 0x1cd   : > { %2131 = vmatmul.mubr.msk.f32.gmra.mxu0 %vm294_vm0, %v523_v47 }
 0x1ce   : > { %871 = vmatprep.mubr.f32.mxu0 %v3272_v0 }
 0x1d0   : > { %v524_v48 = vpop.trf.xlu0 }
 0x1d1   : > { %2132 = vmatmul.mubr.msk.f32.gmra.mxu0 %vm294_vm0, %v524_v48 }
 0x1d2   : > { %1267 = vmatprep.mubr.f32.mxu0 %v2513_v11 }
 0x215   : > { %v2579_v49 = vpop.f32.mrf.mxu0 }
 0x217   : > { %v2581_v50 = vpop.f32.mrf.mxu0 }
 0x218   : > { %v878_v51 = vmax.f32 %v2579_v49, %v2581_v50 }
 0x219   : > { %v2585_v52 = vpop.f32.mrf.mxu0 }
 0x21a   : > { %879 = vmax.xlane.f32.xlu1 %v878_v51 }
 0x21b   : > { %v2587_v53 = vpop.f32.mrf.mxu0 }
 0x21c   : > { %v881_v54 = vmax.f32 %v2585_v52, %v2587_v53 }
 0x21d   : > { %v2591_v55 = vpop.f32.mrf.mxu0 }
 0x21e   : > { %882 = vmax.xlane.f32.xlu1 %v881_v54 }
 0x21f   : > { %v2593_v56 = vpop.f32.mrf.mxu0 }
 0x220   : > { %v884_v57 = vmax.f32 %v2591_v55, %v2593_v56 }
 0x221   : > { %v2597_v58 = vpop.f32.mrf.mxu0 }
 0x222   : > { %885 = vmax.xlane.f32.xlu1 %v884_v57 }
 0x223   : > { %v2599_v59 = vpop.f32.mrf.mxu0 }
 0x224   : > { %v887_v60 = vmax.f32 %v2597_v58, %v2599_v59 }
 0x225   : > { %v2603_v61 = vpop.f32.mrf.mxu0 }
 0x226   : > { %888 = vmax.xlane.f32.xlu1 %v887_v60 }
 0x227   : > { %v2605_v62 = vpop.f32.mrf.mxu0 }
 0x228   : > { %v890_v63 = vmax.f32 %v2603_v61, %v2605_v62 }
 0x229   : > { %v2609_v1 = vpop.f32.mrf.mxu0 }
 0x22a   : > { %891 = vmax.xlane.f32.xlu1 %v890_v63 }
 0x22b   : > { %v2611_v2 = vpop.f32.mrf.mxu0 }
 0x22c   : > { %v893_v3 = vmax.f32 %v2609_v1, %v2611_v2 }
 0x22d   : > { %v2615_v4 = vpop.f32.mrf.mxu0 }
 0x22e   : > { %894 = vmax.xlane.f32.xlu1 %v893_v3 }
 0x22f   : > { %v2617_v5 = vpop.f32.mrf.mxu0 }
 0x230   : > { %v896_v6 = vmax.f32 %v2615_v4, %v2617_v5 }
 0x231   : > { %v2621_v7 = vpop.f32.mrf.mxu0 }
 0x232   : > { %897 = vmax.xlane.f32.xlu1 %v896_v6 }
 0x233   : > { %v2623_v8 = vpop.f32.mrf.mxu0 }
 0x234   : > { %v899_v10 = vmax.f32 %v2621_v7, %v2623_v8 }
 0x235   : > { %v2627_v11 = vpop.f32.mrf.mxu0 }
 0x236   : > { %900 = vmax.xlane.f32.xlu1 %v899_v10 }
 0x237   : > { %v2629_v12 = vpop.f32.mrf.mxu0 }
 0x238   : > { %v902_v13 = vmax.f32 %v2627_v11, %v2629_v12 }
 0x239   : > { %v2633_v14 = vpop.f32.mrf.mxu0 }
 0x23a   : > { %903 = vmax.xlane.f32.xlu1 %v902_v13 }
 0x23b   : > { %v2635_v15 = vpop.f32.mrf.mxu0 }
 0x23c   : > { %v905_v16 = vmax.f32 %v2633_v14, %v2635_v15 }
 0x23d   : > { %v2639_v17 = vpop.f32.mrf.mxu0 }
 0x23e   : > { %3315 = vst [vmem:[#allocation3_spill] sm:$0xff] %v2639_v17  ;;  %906 = vmax.xlane.f32.xlu1 %v905_v16 }
 0x23f   : > { %v2641_v18 = vpop.f32.mrf.mxu0 }
 0x240   : > { %v908_v19 = vmax.f32 %v2639_v17, %v2641_v18 }
 0x241   : > { %v2645_v20 = vpop.f32.mrf.mxu0 }
 0x242   : > { %3316 = vst [vmem:[#allocation4_spill] sm:$0xff] %v2645_v20  ;;  %909 = vmax.xlane.f32.xlu1 %v908_v19 }
 0x243   : > { %v2647_v21 = vpop.f32.mrf.mxu0 }
 0x244   : > { %3317 = vst [vmem:[#allocation5_spill] sm:$0xff] %v2647_v21  ;;  %v911_v22 = vmax.f32 %v2645_v20, %v2647_v21 }
 0x245   : > { %v2651_v23 = vpop.f32.mrf.mxu0 }
 0x246   : > { %3318 = vst [vmem:[#allocation6_spill] sm:$0xff] %v2651_v23  ;;  %912 = vmax.xlane.f32.xlu1 %v911_v22 }
 0x247   : > { %v2653_v24 = vpop.f32.mrf.mxu0 }
 0x248   : > { %3319 = vst [vmem:[#allocation7_spill] sm:$0xff] %v2653_v24  ;;  %v914_v25 = vmax.f32 %v2651_v23, %v2653_v24 }
 0x249   : > { %v2657_v26 = vpop.f32.mrf.mxu0 }
 0x24a   : > { %3320 = vst [vmem:[#allocation8_spill] sm:$0xff] %v2657_v26  ;;  %915 = vmax.xlane.f32.xlu1 %v914_v25 }
 0x24b   : > { %v2659_v27 = vpop.f32.mrf.mxu0 }
 0x24c   : > { %3321 = vst [vmem:[#allocation9_spill] sm:$0xff] %v2659_v27  ;;  %v917_v28 = vmax.f32 %v2657_v26, %v2659_v27 }
 0x24d   : > { %v2663_v29 = vpop.f32.mrf.mxu0 }
 0x24e   : > { %3322 = vst [vmem:[#allocation10_spill] sm:$0xff] %v2663_v29  ;;  %918 = vmax.xlane.f32.xlu1 %v917_v28 }
 0x24f   : > { %v2665_v30 = vpop.f32.mrf.mxu0 }
 0x250   : > { %3323 = vst [vmem:[#allocation11_spill] sm:$0xff] %v2665_v30  ;;  %v920_v31 = vmax.f32 %v2663_v29, %v2665_v30 }
 0x251   : > { %v2669_v32 = vpop.f32.mrf.mxu0 }
 0x252   : > { %921 = vmax.xlane.f32.xlu1 %v920_v31 }
 0x253   : > { %v2671_v33 = vpop.f32.mrf.mxu0 }
 0x254   : > { %v923_v34 = vmax.f32 %v2669_v32, %v2671_v33 }
 0x255   : > { %v2675_v35 = vpop.f32.mrf.mxu0 }
 0x256   : > { %3324 = vst [vmem:[#allocation12_spill] sm:$0xff] %v2675_v35  ;;  %924 = vmax.xlane.f32.xlu1 %v923_v34 }
 0x257   : > { %v2677_v36 = vpop.f32.mrf.mxu0 }
 0x258   : > { %3325 = vst [vmem:[#allocation13_spill] sm:$0xff] %v2677_v36  ;;  %v926_v37 = vmax.f32 %v2675_v35, %v2677_v36 }
 0x259   : > { %v2681_v38 = vpop.f32.mrf.mxu0 }
 0x25a   : > { %3326 = vst [vmem:[#allocation14_spill] sm:$0xff] %v2681_v38  ;;  %927 = vmax.xlane.f32.xlu1 %v926_v37 }
 0x25b   : > { %v2683_v39 = vpop.f32.mrf.mxu0 }
 0x25c   : > { %3327 = vst [vmem:[#allocation15_spill] sm:$0xff] %v2683_v39  ;;  %v929_v40 = vmax.f32 %v2681_v38, %v2683_v39 }
 0x25d   : > { %v2687_v41 = vpop.f32.mrf.mxu0 }
 0x25e   : > { %3328 = vst [vmem:[#allocation16_spill] sm:$0xff] %v2687_v41  ;;  %930 = vmax.xlane.f32.xlu0 %v929_v40 }
 0x25f   : > { %v2689_v42 = vpop.f32.mrf.mxu0 }
 0x260   : > { %3329 = vst [vmem:[#allocation17_spill] sm:$0xff] %v2689_v42  ;;  %v932_v43 = vmax.f32 %v2687_v41, %v2689_v42 }
 0x261   : > { %v2693_v44 = vpop.f32.mrf.mxu0 }
 0x262   : > { %3330 = vst [vmem:[#allocation18_spill] sm:$0xff] %v2693_v44  ;;  %933 = vmax.xlane.f32.xlu1 %v932_v43 }
 0x263   : > { %v2695_v45 = vpop.f32.mrf.mxu0 }
 0x264   : > { %3331 = vst [vmem:[#allocation19_spill] sm:$0xff] %v2695_v45  ;;  %v935_v46 = vmax.f32 %v2693_v44, %v2695_v45 }
 0x265   : > { %v2699_v47 = vpop.f32.mrf.mxu0 }
 0x266   : > { %3332 = vst [vmem:[#allocation20_spill] sm:$0xff] %v2699_v47  ;;  %936 = vmax.xlane.f32.xlu1 %v935_v46 }
 0x267   : > { %v2701_v48 = vpop.f32.mrf.mxu0 }
 0x268   : > { %3333 = vst [vmem:[#allocation21_spill] sm:$0xff] %v2701_v48  ;;  %v938_v51 = vmax.f32 %v2699_v47, %v2701_v48 }
 0x269   : > { %v2705_v54 = vpop.f32.mrf.mxu0 }
 0x26a   : > { %3334 = vst [vmem:[#allocation22_spill] sm:$0xff] %v2705_v54  ;;  %939 = vmax.xlane.f32.xlu1 %v938_v51 }
 0x26b   : > { %v2707_v57 = vpop.f32.mrf.mxu0 }
 0x26c   : > { %3335 = vst [vmem:[#allocation23_spill] sm:$0xff] %v2707_v57  ;;  %v941_v60 = vmax.f32 %v2705_v54, %v2707_v57 }
 0x26d   : > { %v2711_v63 = vpop.f32.mrf.mxu0 }
 0x26e   : > { %3336 = vst [vmem:[#allocation24_spill] sm:$0xff] %v2711_v63  ;;  %942 = vmax.xlane.f32.xlu1 %v941_v60 }
 0x26f   : > { %v2713_v3 = vpop.f32.mrf.mxu0 }
 0x270   : > { %3337 = vst [vmem:[#allocation25_spill] sm:$0xff] %v2713_v3  ;;  %v944_v6 = vmax.f32 %v2711_v63, %v2713_v3 }
 0x271   : > { %v2717_v10 = vpop.f32.mrf.mxu0 }
 0x272   : > { %3338 = vst [vmem:[#allocation26_spill] sm:$0xff] %v2717_v10  ;;  %945 = vmax.xlane.f32.xlu1 %v944_v6 }
 0x273   : > { %v2719_v13 = vpop.f32.mrf.mxu0 }
 0x274   : > { %3339 = vst [vmem:[#allocation27_spill] sm:$0xff] %v2719_v13  ;;  %v947_v16 = vmax.f32 %v2717_v10, %v2719_v13 }
 0x275   : > { %v2723_v19 = vpop.f32.mrf.mxu0 }
 0x276   : > { %3340 = vst [vmem:[#allocation28_spill] sm:$0xff] %v2723_v19  ;;  %948 = vmax.xlane.f32.xlu1 %v947_v16 }
 0x277   : > { %v2725_v22 = vpop.f32.mrf.mxu0 }
 0x278   : > { %3341 = vst [vmem:[#allocation29_spill] sm:$0xff] %v2725_v22  ;;  %v950_v25 = vmax.f32 %v2723_v19, %v2725_v22 }
 0x279   : > { %v2729_v28 = vpop.f32.mrf.mxu0 }
 0x27a   : > { %3342 = vst [vmem:[#allocation30_spill] sm:$0xff] %v2729_v28  ;;  %951 = vmax.xlane.f32.xlu1 %v950_v25 }
 0x27b   : > { %v2731_v31 = vpop.f32.mrf.mxu0 }
 0x27c   : > { %3343 = vst [vmem:[#allocation31_spill] sm:$0xff] %v2731_v31  ;;  %v953_v34 = vmax.f32 %v2729_v28, %v2731_v31 }
 0x27d   : > { %v2735_v37 = vpop.f32.mrf.mxu0 }
 0x27e   : > { %3344 = vst [vmem:[#allocation32_spill] sm:$0xff] %v2735_v37  ;;  %954 = vmax.xlane.f32.xlu1 %v953_v34 }
 0x27f   : > { %v2737_v40 = vpop.f32.mrf.mxu0 }
 0x280   : > { %3345 = vst [vmem:[#allocation33_spill] sm:$0xff] %v2737_v40  ;;  %v956_v43 = vmax.f32 %v2735_v37, %v2737_v40 }
 0x281   : > { %v2741_v46 = vpop.f32.mrf.mxu0 }
 0x282   : > { %3346 = vst [vmem:[#allocation34_spill] sm:$0xff] %v2741_v46  ;;  %957 = vmax.xlane.f32.xlu1 %v956_v43 }
 0x283   : > { %v2743_v51 = vpop.f32.mrf.mxu0 }
 0x284   : > { %3347 = vst [vmem:[#allocation35_spill] sm:$0xff] %v2743_v51  ;;  %v959_v60 = vmax.f32 %v2741_v46, %v2743_v51 }
 0x285   : > { %v2747_v6 = vpop.f32.mrf.mxu0 }
 0x286   : > { %3348 = vst [vmem:[#allocation36_spill] sm:$0xff] %v2747_v6  ;;  %960 = vmax.xlane.f32.xlu1 %v959_v60 }
 0x287   : > { %v2749_v16 = vpop.f32.mrf.mxu0 }
 0x288   : > { %3349 = vst [vmem:[#allocation37_spill] sm:$0xff] %v2749_v16  ;;  %v962_v25 = vmax.f32 %v2747_v6, %v2749_v16 }
 0x289   : > { %v2753_v34 = vpop.f32.mrf.mxu0 }
 0x28a   : > { %3350 = vst [vmem:[#allocation38_spill] sm:$0xff] %v2753_v34  ;;  %963 = vmax.xlane.f32.xlu1 %v962_v25 }
 0x28b   : > { %v2755_v0 = vpop.f32.mrf.mxu0 }
 0x28c   : > { %3351 = vst [vmem:[#allocation39_spill] sm:$0xff] %v2755_v0  ;;  %v965_v43 = vmax.f32 %v2753_v34, %v2755_v0 }
 0x28d   : > { %v2759_v9 = vpop.f32.mrf.mxu0 }
 0x28e   : > { %3352 = vst [vmem:[#allocation40_spill] sm:$0xff] %v2759_v9  ;;  %966 = vmax.xlane.f32.xlu1 %v965_v43 }
 0x28f   : > { %v2761_v54 = vpop.f32.mrf.mxu0 }
 0x290   : > { %3353 = vst [vmem:[#allocation41_spill] sm:$0xff] %v2761_v54  ;;  %v968_v60 = vmax.f32 %v2759_v9, %v2761_v54 }
 0x291   : > { %v2765_v57 = vpop.f32.mrf.mxu0 }
 0x292   : > { %3354 = vst [vmem:[#allocation42_spill] sm:$0xff] %v2765_v57  ;;  %969 = vmax.xlane.f32.xlu1 %v968_v60 }
 0x293   : > { %v2767_v63 = vpop.f32.mrf.mxu0 }
 0x294   : > { %3355 = vst [vmem:[#allocation43_spill] sm:$0xff] %v2767_v63  ;;  %v971_v25 = vmax.f32 %v2765_v57, %v2767_v63 }
 0x296   : > { %972 = vmax.xlane.f32.xlu1 %v971_v25 }
 0x2a3   : > { %v880_v3 = vpop.xlane.xlu1 %879 }
 0x2a7   : > { %v883_v10 = vpop.xlane.xlu1 %882 }
 0x2ab   : > { %v886_v13 = vpop.xlane.xlu1 %885 }
 0x2af   : > { %v889_v19 = vpop.xlane.xlu1 %888 }
 0x2b3   : > { %v892_v22 = vpop.xlane.xlu1 %891 }
 0x2b4   : > { %v974_v60 = vmax.f32 %v880_v3, %v892_v22 }
 0x2b7   : > { %v895_v43 = vpop.xlane.xlu1 %894 }
 0x2bb   : > { %v898_v28 = vpop.xlane.xlu1 %897 }
 0x2bf   : > { %v901_v31 = vpop.xlane.xlu1 %900 }
 0x2c0   : > { %v977_v51 = vmax.f32 %v889_v19, %v901_v31  ;;  %v975_v19 = vmax.f32 %v883_v10, %v895_v43 }
 0x2c3   : > { %v904_v37 = vpop.xlane.xlu1 %903 }
 0x2c4   : > { %v978_v34 = vmax.f32 %v974_v60, %v904_v37 }
 0x2c7   : > { %v907_v40 = vpop.xlane.xlu1 %906 }
 0x2c8   : > { %v979_v31 = vmax.f32 %v975_v19, %v907_v40 }
 0x2cb   : > { %v910_v46 = vpop.xlane.xlu1 %909 }
 0x2cf   : > { %v913_v6 = vpop.xlane.xlu1 %912 }
 0x2d0   : > { %v981_v16 = vmax.f32 %v977_v51, %v913_v6 }
 0x2d3   : > { %v916_v0 = vpop.xlane.xlu1 %915 }
 0x2d4   : > { %v982_v9 = vmax.f32 %v978_v34, %v916_v0  ;;  %v976_v34 = vmax.f32 %v886_v13, %v898_v28 }
 0x2d6   : > { %v980_v17 = vmax.f32 %v976_v34, %v910_v46 }
 0x2d7   : > { %v919_v54 = vpop.xlane.xlu1 %918 }
 0x2d8   : > { %v983_v37 = vmax.f32 %v979_v31, %v919_v54 }
 0x2db   : > { %v922_v25 = vpop.xlane.xlu1 %921 }
 0x2dc   : > { %v984_v24 = vmax.f32 %v980_v17, %v922_v25 }
 0x2df   : > { %v925_v57 = vpop.xlane.xlu1 %924 }
 0x2e0   : > { %v985_v26 = vmax.f32 %v981_v16, %v925_v57 }
 0x2e3   : > { %v928_v63 = vpop.xlane.xlu1 %927 }
 0x2e4   : > { %v986_v51 = vmax.f32 %v982_v9, %v928_v63 }
 0x2e7   : > { %v931_v3 = vpop.xlane.xlu0 %930 }
 0x2e8   : > { %v987_v0 = vmax.f32 %v983_v37, %v931_v3 }
 0x2eb   : > { %v934_v48 = vpop.xlane.xlu1 %933 }
 0x2ec   : > { %v988_v30 = vmax.f32 %v984_v24, %v934_v48 }
 0x2ef   : > { %v937_v47 = vpop.xlane.xlu1 %936 }
 0x2f0   : > { %v989_v10 = vmax.f32 %v985_v26, %v937_v47 }
 0x2f3   : > { %v940_v45 = vpop.xlane.xlu1 %939 }
 0x2f4   : > { %v990_v60 = vmax.f32 %v986_v51, %v940_v45 }
 0x2f7   : > { %v943_v44 = vpop.xlane.xlu1 %942 }
 0x2f8   : > { %v991_v35 = vmax.f32 %v987_v0, %v943_v44 }
 0x2fb   : > { %v946_v42 = vpop.xlane.xlu1 %945 }
 0x2fc   : > { %v992_v19 = vmax.f32 %v988_v30, %v946_v42 }
 0x2ff   : > { %v949_v41 = vpop.xlane.xlu1 %948 }
 0x300   : > { %v993_v54 = vmax.f32 %v989_v10, %v949_v41 }
 0x303   : > { %v952_v39 = vpop.xlane.xlu1 %951 }
 0x304   : > { %v994_v20 = vmax.f32 %v990_v60, %v952_v39 }
 0x307   : > { %v955_v38 = vpop.xlane.xlu1 %954 }
 0x308   : > { %v995_v21 = vmax.f32 %v991_v35, %v955_v38 }
 0x30b   : > { %v958_v36 = vpop.xlane.xlu1 %957 }
 0x30c   : > { %v996_v9 = vmax.f32 %v992_v19, %v958_v36 }
 0x30f   : > { %v961_v22 = vpop.xlane.xlu1 %960 }
 0x310   : > { %v997_v63 = vmax.f32 %v993_v54, %v961_v22 }
 0x313   : > { %v964_v6 = vpop.xlane.xlu1 %963 }
 0x314   : > { %v998_v27 = vmax.f32 %v994_v20, %v964_v6 }
 0x317   : > { %v967_v23 = vpop.xlane.xlu1 %966 }
 0x318   : > { %v999_v29 = vmax.f32 %v995_v21, %v967_v23 }
 0x31a   : > { %v1002_v40 = vmax.f32 %v998_v27, %v999_v29 }
 0x31b   : > { %v970_v43 = vpop.xlane.xlu1 %969 }
 0x31c   : > { %v1000_v13 = vmax.f32 %v996_v9, %v970_v43 }
 0x31f   : > { %v973_v31 = vpop.xlane.xlu1 %972 }
 0x320   : > { %v1001_v45 = vmax.f32 %v997_v63, %v973_v31 }
 0x322   : > { %v1003_v44 = vmax.f32 %v1000_v13, %v1001_v45 }
 0x324   : > { %v1004_v28 = vmax.f32 %v1002_v40, %v1003_v44 }
 0x326   : > { %v1005_v39 = vrot.slane %v1004_v28, 4 }
 0x328   : > { %v1006_v35 = vmax.f32 %v1004_v28, %v1005_v39 }
 0x32a   : > { %v1007_v38 = vrot.slane %v1006_v35, 2 }
 0x32c   : > { %v1008_v17 = vmax.f32 %v1006_v35, %v1007_v38  ;;  %v3359_v38 = vld [vmem:[#allocation8_spill] sm:$0xff] }
 0x32e   : > { %v1009_v57 = vrot.slane %v1008_v17, 1 }
 0x330   : > { %v2771_v20 = vmax.f32 %v1008_v17, %v1009_v57 }
 0x332   : > { %v1011_v21 = vsub.f32 %v2579_v49, %v2771_v20  ;;  %v1012_v23 = vsub.f32 %v2581_v50, %v2771_v20  ;;  %v1014_v24 = vsub.f32 %v2587_v53, %v2771_v20  ;;  %v1013_v26 = vsub.f32 %v2585_v52, %v2771_v20 }
 0x333   : > { %v1016_v30 = vsub.f32 %v2593_v56, %v2771_v20  ;;  %v1015_v49 = vsub.f32 %v2591_v55, %v2771_v20  ;;  %v1018_v50 = vsub.f32 %v2599_v59, %v2771_v20  ;;  %v1017_v52 = vsub.f32 %v2597_v58, %v2771_v20 }
 0x334   : > { %v1075_v27 = vmul.f32 1.442695, %v1011_v21  ;;  %v1077_v29 = vmul.f32 1.442695, %v1012_v23  ;;  %v1081_v36 = vmul.f32 1.442695, %v1014_v24  ;;  %v1020_v56 = vsub.f32 %v2605_v62, %v2771_v20 }
 0x335   : > { %v1079_v41 = vmul.f32 1.442695, %v1013_v26  ;;  %v1085_v53 = vmul.f32 1.442695, %v1016_v30  ;;  %v1083_v42 = vmul.f32 1.442695, %v1015_v49  ;;  %v1019_v48 = vsub.f32 %v2603_v61, %v2771_v20 }
 0x336   : > { %2219 = vpow2.f32 %v1075_v27  ;;  %v1089_v47 = vmul.f32 1.442695, %v1018_v50  ;;  %v1087_v55 = vmul.f32 1.442695, %v1017_v52  ;;  %v1022_v59 = vsub.f32 %v2611_v2, %v2771_v20  ;;  %v3360_v21 = vld [vmem:[#allocation7_spill] sm:$0xff]  ;;  %v3361_v26 = vld [vmem:[#allocation6_spill] sm:$0xff] }
 0x337   : > { %2221 = vpow2.f32 %v1077_v29  ;;  %v1093_v46 = vmul.f32 1.442695, %v1020_v56  ;;  %v1021_v58 = vsub.f32 %v2609_v1, %v2771_v20  ;;  %v1023_v62 = vsub.f32 %v2615_v4, %v2771_v20 }
 0x338   : > { %2223 = vpow2.f32 %v1081_v36  ;;  %v1091_v3 = vmul.f32 1.442695, %v1019_v48  ;;  %v1024_v61 = vsub.f32 %v2617_v5, %v2771_v20  ;;  %v1097_v22 = vmul.f32 1.442695, %v1022_v59  ;;  %v3362_v36 = vld [vmem:[#allocation5_spill] sm:$0xff]  ;;  %v3364_v48 = vld [vmem:[#allocation3_spill] sm:$0xff] }
 0x339   : > { %2225 = vpow2.f32 %v1079_v41  ;;  %v1025_v37 = vsub.f32 %v2621_v7, %v2771_v20  ;;  %v1026_v1 = vsub.f32 %v2623_v8, %v2771_v20  ;;  %v1095_v4 = vmul.f32 1.442695, %v1021_v58 }
 0x33a   : > { %2227 = vpow2.f32 %v1085_v53  ;;  %v1027_v5 = vsub.f32 %v2627_v11, %v2771_v20  ;;  %v1099_v51 = vmul.f32 1.442695, %v1023_v62  ;;  %v1028_v6 = vsub.f32 %v2629_v12, %v2771_v20  ;;  %v3363_v53 = vld [vmem:[#allocation4_spill] sm:$0xff] }
 0x33b   : > { %2229 = vpow2.f32 %v1083_v42  ;;  %v1101_v7 = vmul.f32 1.442695, %v1024_v61  ;;  %v1029_v8 = vsub.f32 %v2633_v14, %v2771_v20  ;;  %v1103_v60 = vmul.f32 1.442695, %v1025_v37 }
 0x33c   : > { %2231 = vpow2.f32 %v1089_v47  ;;  %v1030_v11 = vsub.f32 %v2635_v15, %v2771_v20  ;;  %v1105_v10 = vmul.f32 1.442695, %v1026_v1  ;;  %v1041_v12 = vsub.f32 %v2669_v32, %v2771_v20  ;;  %v3356_v32 = vld [vmem:[#allocation11_spill] sm:$0xff] }
 0x33d   : > { %2233 = vpow2.f32 %v1087_v55  ;;  %v1107_v40 = vmul.f32 1.442695, %v1027_v5  ;;  %v1042_v14 = vsub.f32 %v2671_v33, %v2771_v20  ;;  %v1109_v19 = vmul.f32 1.442695, %v1028_v6  ;;  %v3357_v33 = vld [vmem:[#allocation10_spill] sm:$0xff] }
 0x33e   : > { %2235 = vpow2.f32 %v1093_v46  ;;  %v1032_v15 = vsub.f32 %v2641_v18, %v2771_v20  ;;  %v1111_v9 = vmul.f32 1.442695, %v1029_v8  ;;  %v1040_v63 = vsub.f32 %v3356_v32, %v2771_v20  ;;  %v3358_v18 = vld [vmem:[#allocation9_spill] sm:$0xff]  ;;  %v3368_v32 = vld [vmem:[#allocation15_spill] sm:$0xff] }
 0x33f   : > { %2237 = vpow2.f32 %v1091_v3  ;;  %v1113_v31 = vmul.f32 1.442695, %v1030_v11  ;;  %v1039_v13 = vsub.f32 %v3357_v33, %v2771_v20  ;;  %v1135_v45 = vmul.f32 1.442695, %v1041_v12  ;;  %v3366_v12 = vld [vmem:[#allocation13_spill] sm:$0xff]  ;;  %v3369_v33 = vld [vmem:[#allocation16_spill] sm:$0xff] }
 0x340   : > { %2239 = vpow2.f32 %v1097_v22  ;;  %v1038_v28 = vsub.f32 %v3358_v18, %v2771_v20  ;;  %v1137_v39 = vmul.f32 1.442695, %v1042_v14  ;;  %v1037_v17 = vsub.f32 %v3359_v38, %v2771_v20 }
 0x341   : > { %2241 = vpow2.f32 %v1095_v4  ;;  %v1117_v57 = vmul.f32 1.442695, %v1032_v15  ;;  %v1036_v23 = vsub.f32 %v3360_v21, %v2771_v20  ;;  %v1133_v24 = vmul.f32 1.442695, %v1040_v63 }
 0x342   : > { %2243 = vpow2.f32 %v1099_v51  ;;  %v1035_v27 = vsub.f32 %v3361_v26, %v2771_v20  ;;  %v1131_v29 = vmul.f32 1.442695, %v1039_v13  ;;  %v1034_v49 = vsub.f32 %v3362_v36, %v2771_v20  ;;  %v3372_v26 = vld [vmem:[#allocation19_spill] sm:$0xff] }
 0x343   : > { %v2795_v16 = vpop.eup %2219  ;;  %2245 = vpow2.f32 %v1101_v7  ;;  %v1129_v41 = vmul.f32 1.442695, %v1038_v28  ;;  %v1033_v52 = vsub.f32 %v3363_v53, %v2771_v20  ;;  %v1127_v42 = vmul.f32 1.442695, %v1037_v17  ;;  %v3370_v28 = vld [vmem:[#allocation17_spill] sm:$0xff] }
 0x344   : > { %v2799_v25 = vpop.eup %2221  ;;  %2247 = vpow2.f32 %v1103_v60  ;;  %v1125_v56 = vmul.f32 1.442695, %v1036_v23  ;;  %v1031_v55 = vsub.f32 %v3364_v48, %v2771_v20  ;;  %v1123_v59 = vmul.f32 1.442695, %v1035_v27  ;;  %v3365_v60 = vld [vmem:[#allocation12_spill] sm:$0xff] }
 0x345   : > { %1350 = vmatprep.mubr.f32.mxu1 %v2799_v25  ;;  %v2806_v2 = vpop.eup %2223  ;;  %2249 = vpow2.f32 %v1105_v10  ;;  %v1121_v58 = vmul.f32 1.442695, %v1034_v49  ;;  %v1119_v3 = vmul.f32 1.442695, %v1033_v52  ;;  %v1043_v11 = vsub.f32 %v3365_v60, %v2771_v20  ;;  %v3373_v49 = vld [vmem:[#allocation20_spill] sm:$0xff]  ;;  %v3374_v52 = vld [vmem:[#allocation21_spill] sm:$0xff] }
 0x346   : > { %1351 = vmatmul.mubr.f32.vlgmr.msra.gmra.mxu1 %v2795_v16  ;;  %v2816_v0 = vpop.eup %2225  ;;  %2251 = vpow2.f32 %v1107_v40  ;;  %v1115_v37 = vmul.f32 1.442695, %v1031_v55  ;;  %v1044_v40 = vsub.f32 %v3366_v12, %v2771_v20  ;;  %v1046_v63 = vsub.f32 %v3368_v32, %v2771_v20  ;;  %v3375_v55 = vld [vmem:[#allocation43_spill] sm:$0xff] }
 0x347   : > { %1355 = vmatprep.mubr.f32.mxu1 %v2806_v2  ;;  %v2820_v34 = vpop.eup %2227  ;;  %2253 = vpow2.f32 %v1109_v19  ;;  %v3367_v19 = vld [vmem:[#allocation14_spill] sm:$0xff]  ;;  %v1047_v13 = vsub.f32 %v3369_v33, %v2771_v20  ;;  %v1050_v27 = vsub.f32 %v3372_v26, %v2771_v20 }
 0x348   : > { %v2830_v43 = vpop.eup %2229  ;;  %2255 = vpow2.f32 %v1111_v9  ;;  %v1045_v15 = vsub.f32 %v3367_v19, %v2771_v20  ;;  %v1141_v38 = vmul.f32 1.442695, %v1044_v40  ;;  %v3378_v19 = vld [vmem:[#allocation40_spill] sm:$0xff] }
 0x349   : > { %v2834_v54 = vpop.eup %2231  ;;  %2257 = vpow2.f32 %v1113_v31  ;;  %v1147_v53 = vmul.f32 1.442695, %v1047_v13  ;;  %v1153_v60 = vmul.f32 1.442695, %v1050_v27  ;;  %v3380_v13 = vld [vmem:[#allocation38_spill] sm:$0xff] }
 0x34a   : > { %1356 = vmatmul.mubr.f32.gmra.mxu1 %v2816_v0  ;;  %v2844_v44 = vpop.eup %2233  ;;  %2259 = vpow2.f32 %v1135_v45  ;;  %v1139_v45 = vmul.f32 1.442695, %v1043_v11  ;;  %v1143_v23 = vmul.f32 1.442695, %v1045_v15  ;;  %v3377_v11 = vld [vmem:[#allocation41_spill] sm:$0xff]  ;;  %v1071_v15 = vsub.f32 %v3378_v19, %v2771_v20 }
 0x34b   : > { %1360 = vmatprep.mubr.f32.mxu1 %v2820_v34  ;;  %v2848_v35 = vpop.eup %2235  ;;  %2261 = vpow2.f32 %v1137_v39  ;;  %v1048_v39 = vsub.f32 %v3370_v28, %v2771_v20  ;;  %v1072_v12 = vsub.f32 %v3377_v11, %v2771_v20  ;;  %v3381_v28 = vld [vmem:[#allocation37_spill] sm:$0xff] }
 0x34c   : > { %v2858_v30 = vpop.eup %2237  ;;  %2263 = vpow2.f32 %v1117_v57  ;;  %v3371_v57 = vld [vmem:[#allocation18_spill] sm:$0xff] }
 0x34d   : > { %v2862_v50 = vpop.eup %2239  ;;  %2265 = vpow2.f32 %v1133_v24  ;;  %v1049_v21 = vsub.f32 %v3371_v57, %v2771_v20 }
 0x34e   : > { %1361 = vmatmul.mubr.f32.gmra.mxu1 %v2830_v43  ;;  %v2868_v47 = vpop.eup %2241  ;;  %2267 = vpow2.f32 %v1131_v29  ;;  %v1145_v29 = vmul.f32 1.442695, %v1046_v63 }
 0x34f   : > { %1365 = vmatprep.mubr.f32.mxu1 %v2834_v54  ;;  %v2872_v46 = vpop.eup %2243  ;;  %2269 = vpow2.f32 %v1129_v41  ;;  %v1051_v41 = vsub.f32 %v3373_v49, %v2771_v20 }
 0x350   : > { %v2874_v62 = vpop.eup %2245  ;;  %2271 = vpow2.f32 %v1127_v42  ;;  %v1052_v42 = vsub.f32 %v3374_v52, %v2771_v20 }
 0x351   : > { %v2877_v61 = vpop.eup %2247  ;;  %2273 = vpow2.f32 %v1125_v56  ;;  %v1149_v56 = vmul.f32 1.442695, %v1048_v39  ;;  %v1155_v40 = vmul.f32 1.442695, %v1051_v41  ;;  %v1068_v39 = vsub.f32 %v3381_v28, %v2771_v20 }
 0x352   : > { %1366 = vmatmul.mubr.f32.gmra.mxu1 %v2844_v44  ;;  %v2880_v22 = vpop.eup %2249  ;;  %2275 = vpow2.f32 %v1123_v59  ;;  %v1074_v59 = vsub.f32 %v3375_v55, %v2771_v20  ;;  %v1157_v32 = vmul.f32 1.442695, %v1052_v42 }
 0x353   : > { %1370 = vmatprep.mubr.f32.mxu1 %v2848_v35  ;;  %v2882_v1 = vpop.eup %2251  ;;  %2277 = vpow2.f32 %v1121_v58  ;;  %v1151_v58 = vmul.f32 1.442695, %v1049_v21  ;;  %v3383_v21 = vld [vmem:[#allocation35_spill] sm:$0xff] }
 0x354   : > { %v2884_v4 = vpop.eup %2253  ;;  %2279 = vpow2.f32 %v1119_v3  ;;  %v3376_v3 = vld [vmem:[#allocation42_spill] sm:$0xff]  ;;  %v1201_v33 = vmul.f32 1.442695, %v1074_v59  ;;  %v3390_v59 = vld [vmem:[#allocation28_spill] sm:$0xff] }
 0x355   : > { %v2887_v5 = vpop.eup %2255  ;;  %2281 = vpow2.f32 %v1115_v37  ;;  %v1073_v37 = vsub.f32 %v3376_v3, %v2771_v20 }
 0x356   : > { %1371 = vmatmul.mubr.f32.gmra.mxu1 %v2858_v30  ;;  %v2258_v51 = vpop.eup %2257  ;;  %2283 = vpow2.f32 %v1139_v45  ;;  %v1069_v45 = vsub.f32 %v3380_v13, %v2771_v20 }
 0x357   : > { %1375 = vmatprep.mubr.f32.mxu1 %v2862_v50  ;;  %v2890_v6 = vpop.eup %2259  ;;  %2285 = vpow2.f32 %v1141_v38  ;;  %v3382_v38 = vld [vmem:[#allocation36_spill] sm:$0xff] }
 0x358   : > { %v2892_v7 = vpop.eup %2261  ;;  %2287 = vpow2.f32 %v1143_v23  ;;  %v1067_v57 = vsub.f32 %v3382_v38, %v2771_v20  ;;  %v1066_v23 = vsub.f32 %v3383_v21, %v2771_v20  ;;  %v1191_v27 = vmul.f32 1.442695, %v1069_v45 }
 0x359   : > { %v2264_v8 = vpop.eup %2263  ;;  %1203 = vmatprep.subr.mxu0 %v2892_v7  ;;  %2289 = vpow2.f32 %v1145_v29 }
 0x35a   : > { %1376 = vmatmul.mubr.f32.gmra.mxu1 %v2868_v47  ;;  %v2899_v10 = vpop.eup %2265  ;;  %1204 = vmatpush1.msra.mxu0 %v2890_v6  ;;  %2291 = vpow2.f32 %v1147_v53  ;;  %v1187_v49 = vmul.f32 1.442695, %v1067_v57  ;;  %v1185_v53 = vmul.f32 1.442695, %v1066_v23 }
 0x35b   : > { %1380 = vmatprep.mubr.f32.mxu1 %v2874_v62  ;;  %v2904_v14 = vpop.eup %2267  ;;  %1205 = vmatprep.subr.mxu0 %v2899_v10  ;;  %2293 = vpow2.f32 %v1149_v56  ;;  %v3389_v56 = vld [vmem:[#allocation29_spill] sm:$0xff] }
 0x35c   : > { %v2909_v9 = vpop.eup %2269  ;;  %1206 = vmatpush1.msra.mxu0 %v2904_v14  ;;  %2295 = vpow2.f32 %v1151_v58  ;;  %v1059_v58 = vsub.f32 %v3390_v59, %v2771_v20 }
 0x35d   : > { %v2915_v31 = vpop.eup %2271  ;;  %1207 = vmatprep.subr.mxu0 %v2909_v9  ;;  %2297 = vpow2.f32 %v1153_v60 }
 0x35e   : > { %1381 = vmatmul.mubr.f32.gmra.mxu1 %v2872_v46  ;;  %v2274_v18 = vpop.eup %2273  ;;  %1208 = vmatpush1.msra.mxu0 %v2915_v31  ;;  %2299 = vpow2.f32 %v1155_v40  ;;  %v3393_v40 = vld [vmem:[#allocation25_spill] sm:$0xff] }
 0x35f   : > { %1385 = vmatprep.mubr.f32.mxu1 %v2880_v22  ;;  %v2923_v17 = vpop.eup %2275  ;;  %1209 = vmatprep.subr.mxu0 %v2274_v18  ;;  %2301 = vpow2.f32 %v1157_v32  ;;  %v1056_v19 = vsub.f32 %v3393_v40, %v2771_v20  ;;  %v3394_v32 = vld [vmem:[#allocation24_spill] sm:$0xff] }
 0x360   : > { %v2278_v24 = vpop.eup %2277  ;;  %1210 = vmatpush1.msra.mxu0 %v2923_v17  ;;  %2303 = vpow2.f32 %v1201_v33 }
 0x361   : > { %v2280_v36 = vpop.eup %2279  ;;  %1211 = vmatprep.subr.mxu0 %v2278_v24  ;;  %v1165_v28 = vmul.f32 1.442695, %v1056_v19 }
 0x362   : > { %1386 = vmatmul.mubr.f32.gmra.mxu1 %v2877_v61  ;;  %1212 = vmatpush1.msra.mxu0 %v2280_v36  ;;  %v2282_v48 = vpop.eup %2281 }
 0x363   : > { %1390 = vmatprep.mubr.f32.mxu1 %v2884_v4  ;;  %1213 = vmatprep.subr.mxu0 %v2264_v8  ;;  %v2967_v29 = vpop.eup %2283 }
 0x364   : > { %1214 = vmatpush1.msra.mxu0 %v2282_v48 }
 0x365   : > { %1215 = vmatprep.subr.mxu0 %v2258_v51 }
 0x366   : > { %1391 = vmatmul.mubr.f32.gmra.mxu1 %v2882_v1  ;;  %1216 = vmatpush1.msra.mxu0 %v2887_v5 }
 0x367   : > { %1395 = vmatprep.mubr.f32.mxu1 %v2258_v51  ;;  %1217 = vmatprep.subr.mxu0 %v2884_v4  ;;  %v1199_v51 = vmul.f32 1.442695, %v1073_v37  ;;  %v1195_v4 = vmul.f32 1.442695, %v1071_v15 }
 0x368   : > { %1218 = vmatpush1.msra.mxu0 %v2882_v1 }
 0x369   : > { %1219 = vmatprep.subr.mxu0 %v2880_v22  ;;  %2305 = vpow2.f32 %v1199_v51  ;;  %v3385_v22 = vld [vmem:[#allocation33_spill] sm:$0xff] }
 0x36a   : > { %1396 = vmatmul.mubr.f32.gmra.mxu1 %v2887_v5  ;;  %v1197_v5 = vmul.f32 1.442695, %v1072_v12  ;;  %1220 = vmatpush1.msra.mxu0 %v2877_v61  ;;  %v1189_v61 = vmul.f32 1.442695, %v1068_v39 }
 0x36b   : > { %1400 = vmatprep.mubr.f32.mxu1 %v2264_v8  ;;  %v3379_v8 = vld [vmem:[#allocation39_spill] sm:$0xff]  ;;  %1221 = vmatprep.subr.mxu0 %v2874_v62  ;;  %v3386_v62 = vld [vmem:[#allocation32_spill] sm:$0xff] }
 0x36c   : > { %v1070_v63 = vsub.f32 %v3379_v8, %v2771_v20  ;;  %1222 = vmatpush1.msra.mxu0 %v2872_v46  ;;  %2307 = vpow2.f32 %v1197_v5  ;;  %v2972_v46 = vpop.eup %2285  ;;  %v1055_v8 = vsub.f32 %v3394_v32, %v2771_v20 }
 0x36d   : > { %1223 = vmatprep.subr.mxu0 %v2862_v50  ;;  %2309 = vpow2.f32 %v1195_v4  ;;  %v2977_v50 = vpop.eup %2287 }
 0x36e   : > { %1401 = vmatmul.mubr.f32.gmra.mxu1 %v2282_v48  ;;  %v1193_v1 = vmul.f32 1.442695, %v1070_v63  ;;  %1224 = vmatpush1.msra.mxu0 %v2868_v47  ;;  %v2983_v47 = vpop.eup %2289  ;;  %v1060_v48 = vsub.f32 %v3389_v56, %v2771_v20  ;;  %v1171_v63 = vmul.f32 1.442695, %v1059_v58  ;;  %v1163_v39 = vmul.f32 1.442695, %v1055_v8 }
 0x36f   : > { %1405 = vmatprep.mubr.f32.mxu1 %v2278_v24  ;;  %v3384_v24 = vld [vmem:[#allocation34_spill] sm:$0xff]  ;;  %1225 = vmatprep.subr.mxu0 %v2848_v35  ;;  %v2989_v35 = vpop.eup %2291 }
 0x370   : > { %v1065_v26 = vsub.f32 %v3384_v24, %v2771_v20  ;;  %2311 = vpow2.f32 %v1193_v1  ;;  %1226 = vmatpush1.msra.mxu0 %v2858_v30  ;;  %v2994_v30 = vpop.eup %2293  ;;  %v1173_v15 = vmul.f32 1.442695, %v1060_v48 }
 0x371   : > { %2313 = vpow2.f32 %v1191_v27  ;;  %1227 = vmatprep.subr.mxu0 %v2834_v54  ;;  %v2999_v54 = vpop.eup %2295 }
 0x372   : > { %1406 = vmatmul.mubr.f32.gmra.mxu1 %v2280_v36  ;;  %v1063_v36 = vsub.f32 %v3386_v62, %v2771_v20  ;;  %v1183_v42 = vmul.f32 1.442695, %v1065_v26  ;;  %2315 = vpow2.f32 %v1189_v61  ;;  %1228 = vmatpush1.msra.mxu0 %v2844_v44  ;;  %v3005_v44 = vpop.eup %2297 }
 0x373   : > { %1410 = vmatprep.mubr.f32.mxu1 %v2274_v18  ;;  %v1064_v18 = vsub.f32 %v3385_v22, %v2771_v20  ;;  %2317 = vpow2.f32 %v1187_v49  ;;  %1229 = vmatprep.subr.mxu0 %v2820_v34  ;;  %v3011_v34 = vpop.eup %2299 }
 0x374   : > { %v1179_v3 = vmul.f32 1.442695, %v1063_v36  ;;  %2319 = vpow2.f32 %v1185_v53  ;;  %1230 = vmatpush1.msra.mxu0 %v2830_v43  ;;  %v3016_v43 = vpop.eup %2301  ;;  %v3397_v53 = vld [vmem:[#allocation2_spill] sm:$0xff] }
 0x375   : > { %v1181_v55 = vmul.f32 1.442695, %v1064_v18  ;;  %2321 = vpow2.f32 %v1183_v42  ;;  %1231 = vmatprep.subr.mxu0 %v2806_v2  ;;  %v3021_v2 = vpop.eup %2303 }
 0x376   : > { %1411 = vmatmul.mubr.f32.gmra.mxu1 %v2923_v17  ;;  %v3387_v17 = vld [vmem:[#allocation31_spill] sm:$0xff]  ;;  %1232 = vmatpush1.msra.mxu0 %v2816_v0  ;;  %v3027_v0 = vpop.eup %2305 }
 0x377   : > { %1415 = vmatprep.mubr.f32.mxu1 %v2909_v9  ;;  %v1062_v41 = vsub.f32 %v3387_v17, %v2771_v20  ;;  %v3388_v9 = vld [vmem:[#allocation30_spill] sm:$0xff]  ;;  %2323 = vpow2.f32 %v1181_v55  ;;  %1233 = vmatprep.subr.mxu0 %v2799_v25 }
 0x378   : > { %v1061_v52 = vsub.f32 %v3388_v9, %v2771_v20  ;;  %2325 = vpow2.f32 %v1179_v3  ;;  %1234 = vmatpush1.msra.mxu0 %v2795_v16  ;;  %v3398_v9 = vmov 0.0  }
 0x379   : > { %v1177_v60 = vmul.f32 1.442695, %v1062_v41  ;;  %1235 = vmatprep.subr.mxu0 %v3021_v2  ;;  %v3031_v25 = vpop.eup %2307 }
 0x37a   : > { %1416 = vmatmul.mubr.f32.gmra.mxu1 %v2915_v31  ;;  %v3391_v31 = vld [vmem:[#allocation27_spill] sm:$0xff]  ;;  %v1175_v12 = vmul.f32 1.442695, %v1061_v52  ;;  %1236 = vmatpush2.msra.mxu0 %v3027_v0 }
 0x37b   : > { %1420 = vmatprep.mubr.f32.mxu1 %v2899_v10  ;;  %v1058_v37 = vsub.f32 %v3391_v31, %v2771_v20  ;;  %v3392_v10 = vld [vmem:[#allocation26_spill] sm:$0xff]  ;;  %2327 = vpow2.f32 %v1177_v60  ;;  %1237 = vmatprep.subr.mxu0 %v3031_v25 }
 0x37c   : > { %v1057_v11 = vsub.f32 %v3392_v10, %v2771_v20  ;;  %2329 = vpow2.f32 %v1175_v12 }
 0x37d   : > { %v1169_v13 = vmul.f32 1.442695, %v1058_v37  ;;  %2331 = vpow2.f32 %v1173_v15 }
 0x37e   : > { %1421 = vmatmul.mubr.f32.gmra.mxu1 %v2904_v14  ;;  %v3395_v14 = vld [vmem:[#allocation23_spill] sm:$0xff]  ;;  %v1167_v51 = vmul.f32 1.442695, %v1057_v11  ;;  %2333 = vpow2.f32 %v1171_v63 }
 0x37f   : > { %1425 = vmatprep.mubr.f32.mxu1 %v2892_v7  ;;  %v1054_v33 = vsub.f32 %v3395_v14, %v2771_v20  ;;  %v3396_v7 = vld [vmem:[#allocation22_spill] sm:$0xff]  ;;  %2335 = vpow2.f32 %v1169_v13 }
 0x380   : > { %v1053_v45 = vsub.f32 %v3396_v7, %v2771_v20  ;;  %v3034_v20 = vpop.eup %2309  ;;  %2337 = vpow2.f32 %v1167_v51 }
 0x381   : > { %v1161_v5 = vmul.f32 1.442695, %v1054_v33  ;;  %v3037_v16 = vpop.eup %2311  ;;  %1238 = vmatpush2.msra.mxu0 %v3034_v20  ;;  %2339 = vpow2.f32 %v1165_v28 }
 0x382   : > { %1426 = vmatmul.mubr.f32.gmra.mxu1 %v2890_v6  ;;  %v1159_v6 = vmul.f32 1.442695, %v1053_v45  ;;  %v3041_v38 = vpop.eup %2313  ;;  %1239 = vmatprep.subr.mxu0 %v3037_v16  ;;  %2341 = vpow2.f32 %v1163_v39 }
 0x383   : > { %1430 = vmatprep.mubr.f32.mxu1 %v2972_v46  ;;  %v3045_v57 = vpop.eup %2315  ;;  %1240 = vmatpush2.msra.mxu0 %v3041_v38  ;;  %2343 = vpow2.f32 %v1161_v5 }
 0x384   : > { %v3048_v4 = vpop.eup %2317  ;;  %1241 = vmatprep.subr.mxu0 %v3045_v57  ;;  %2345 = vpow2.f32 %v1159_v6 }
 0x385   : > { %v2320_v21 = vpop.eup %2319  ;;  %1242 = vmatpush2.msra.mxu0 %v3048_v4 }
 0x386   : > { %1431 = vmatmul.mubr.f32.gmra.mxu1 %v2967_v29  ;;  %v2322_v23 = vpop.eup %2321  ;;  %1243 = vmatprep.subr.mxu0 %v2320_v21 }
 0x387   : > { %1435 = vmatprep.mubr.f32.mxu1 %v2983_v47  ;;  %v2324_v1 = vpop.eup %2323  ;;  %1244 = vmatpush2.msra.mxu0 %v2322_v23 }
 0x388   : > { %v2326_v24 = vpop.eup %2325  ;;  %1245 = vmatprep.subr.mxu0 %v2324_v1 }
 0x389   : > { %v2328_v26 = vpop.eup %2327  ;;  %1246 = vmatpush2.msra.mxu0 %v2326_v24 }
 0x38a   : > { %1436 = vmatmul.mubr.f32.gmra.mxu1 %v2977_v50  ;;  %v2330_v27 = vpop.eup %2329  ;;  %1247 = vmatprep.subr.mxu0 %v2328_v26 }
 0x38b   : > { %1440 = vmatprep.mubr.f32.mxu1 %v2994_v30  ;;  %v2332_v22 = vpop.eup %2331  ;;  %1248 = vmatpush2.msra.mxu0 %v2330_v27 }
 0x38c   : > { %v2334_v18 = vpop.eup %2333  ;;  %1249 = vmatprep.subr.mxu0 %v2332_v22 }
 0x38d   : > { %v2336_v61 = vpop.eup %2335  ;;  %1250 = vmatpush2.msra.mxu0 %v2334_v18 }
 0x38e   : > { %1441 = vmatmul.mubr.f32.gmra.mxu1 %v2989_v35  ;;  %v2338_v62 = vpop.eup %2337  ;;  %1251 = vmatprep.subr.mxu0 %v2336_v61 }
 0x38f   : > { %1445 = vmatprep.mubr.f32.mxu1 %v3005_v44  ;;  %v2340_v36 = vpop.eup %2339  ;;  %1252 = vmatpush2.msra.mxu0 %v2338_v62 }
 0x390   : > { %v2342_v49 = vpop.eup %2341  ;;  %1253 = vmatprep.subr.mxu0 %v2340_v36 }
 0x391   : > { %v2344_v17 = vpop.eup %2343  ;;  %1254 = vmatpush2.msra.mxu0 %v2342_v49 }
 0x392   : > { %1446 = vmatmul.mubr.f32.gmra.mxu1 %v2999_v54  ;;  %v2346_v41 = vpop.eup %2345  ;;  %1255 = vmatprep.subr.mxu0 %v2344_v17 }
 0x393   : > { %1450 = vmatprep.mubr.f32.mxu1 %v3016_v43  ;;  %1256 = vmatpush2.msra.mxu0 %v2346_v41 }
 0x394   : > { %1257 = vmatprep.subr.mxu0 %v3016_v43 }
 0x395   : > { %1258 = vmatpush2.msra.mxu0 %v3011_v34 }
 0x396   : > { %1451 = vmatmul.mubr.f32.gmra.mxu1 %v3011_v34  ;;  %1259 = vmatprep.subr.mxu0 %v3005_v44 }
 0x397   : > { %1455 = vmatprep.mubr.f32.mxu1 %v2344_v17  ;;  %1260 = vmatpush2.msra.mxu0 %v2999_v54 }
 0x398   : > { %1261 = vmatprep.subr.mxu0 %v2994_v30 }
 0x399   : > { %1262 = vmatpush2.msra.mxu0 %v2989_v35 }
 0x39a   : > { %1456 = vmatmul.mubr.f32.gmra.mxu1 %v2346_v41  ;;  %1263 = vmatprep.subr.mxu0 %v2983_v47 }
 0x39b   : > { %1460 = vmatprep.mubr.f32.mxu1 %v2340_v36  ;;  %1264 = vmatpush2.msra.mxu0 %v2977_v50 }
 0x39c   : > { %1265 = vmatprep.subr.mxu0 %v2972_v46 }
 0x39d   : > { %1266 = vmatpush2.msra.mxu0 %v2967_v29  ;;  %v2428_v29 = vmov 0  }
 0x39e   : > { %1461 = vmatmul.mubr.f32.gmra.mxu1 %v2342_v49  ;;  %1268 = vmatmul.mubr.f32.vlgmr.msra.gmra.mxu0 %v3397_v53 }
 0x39f   : > { %1465 = vmatprep.mubr.f32.mxu1 %v2336_v61  ;;  %1802 = vmatprep.mubr.f32.mxu0 %v3398_v9  ;;  %v1276_v9 = vlaneseq }
 0x3a0   : > { %2217 = vset.pattern.permute.xlu0 %v2428_v29  ;;  %2218 = vset.pattern.permute.xlu1 %v2428_v29 }
 0x3a2   : > { %1466 = vmatmul.mubr.f32.gmra.mxu1 %v2338_v62 }
 0x3a3   : > { %1470 = vmatprep.mubr.f32.mxu1 %v2332_v22 }
 0x3a6   : > { %1471 = vmatmul.mubr.f32.gmra.mxu1 %v2334_v18 }
 0x3a7   : > { %1475 = vmatprep.mubr.f32.mxu1 %v2328_v26 }
 0x3aa   : > { %1476 = vmatmul.mubr.f32.gmra.mxu1 %v2330_v27 }
 0x3ab   : > { %1480 = vmatprep.mubr.f32.mxu1 %v2324_v1 }
 0x3ae   : > { %1481 = vmatmul.mubr.f32.gmra.mxu1 %v2326_v24 }
 0x3af   : > { %1485 = vmatprep.mubr.f32.mxu1 %v2320_v21 }
 0x3b2   : > { %1486 = vmatmul.mubr.f32.gmra.mxu1 %v2322_v23 }
 0x3b3   : > { %1490 = vmatprep.mubr.f32.mxu1 %v3045_v57 }
 0x3b6   : > { %1491 = vmatmul.mubr.f32.gmra.mxu1 %v3048_v4 }
 0x3b7   : > { %1495 = vmatprep.mubr.f32.mxu1 %v3037_v16 }
 0x3ba   : > { %1496 = vmatmul.mubr.f32.gmra.mxu1 %v3041_v38 }
 0x3bb   : > { %1500 = vmatprep.mubr.f32.mxu1 %v3031_v25 }
 0x3be   : > { %1501 = vmatmul.mubr.f32.gmra.mxu1 %v3034_v20 }
 0x3bf   : > { %1505 = vmatprep.mubr.f32.mxu1 %v3021_v2 }
 0x3c2   : > { %1506 = vmatmul.mubr.f32.gmra.mxu1 %v3027_v0 }
 0x406   : > { %v3079_v46 = vpop.f32.mrf.mxu1 }
 0x408   : > { %v1354_v50 = vpop.f32.mrf.mxu1 }
 0x40a   : > { %v3081_v52 = vpop.f32.mrf.mxu1 }
 0x40c   : > { %v1359_v42 = vpop.f32.mrf.mxu1 }
 0x40d   : > { %v1277_v42 = vshrl.u32 %v1276_v9, 7 }
 0x40e   : > { %v3083_v47 = vpop.f32.mrf.mxu1 }
 0x410   : > { %v1364_v56 = vpop.f32.mrf.mxu1 }
 0x412   : > { %v3085_v48 = vpop.f32.mrf.mxu1 }
 0x414   : > { %v1369_v55 = vpop.f32.mrf.mxu1 }
 0x416   : > { %v3087_v35 = vpop.f32.mrf.mxu1 }
 0x418   : > { %v1374_v59 = vpop.f32.mrf.mxu1 }
 0x419   : > { %v1278_v59 = vsub.s32 0, %v1277_v42 }
 0x41a   : > { %v3089_v58 = vpop.f32.mrf.mxu1 }
 0x41c   : > { %v1379_v3 = vpop.f32.mrf.mxu1 }
 0x41e   : > { %v3091_v30 = vpop.f32.mrf.mxu1 }
 0x420   : > { %v1384_v31 = vpop.f32.mrf.mxu1 }
 0x422   : > { %v3093_v37 = vpop.f32.mrf.mxu1 }
 0x424   : > { %v1389_v60 = vpop.f32.mrf.mxu1 }
 0x426   : > { %v3095_v54 = vpop.f32.mrf.mxu1 }
 0x428   : > { %v1394_v10 = vpop.f32.mrf.mxu1 }
 0x42a   : > { %v3097_v11 = vpop.f32.mrf.mxu1 }
 0x42c   : > { %v1399_v12 = vpop.f32.mrf.mxu1 }
 0x42e   : > { %v3099_v44 = vpop.f32.mrf.mxu1 }
 0x430   : > { %v1404_v40 = vpop.f32.mrf.mxu1 }
 0x432   : > { %v3101_v19 = vpop.f32.mrf.mxu1 }
 0x433   : > { %2347 = vrcp.f32 %v3101_v19 }
 0x434   : > { %v1409_v15 = vpop.f32.mrf.mxu1  ;;  %2349 = vrcp.f32 %v3089_v58 }
 0x436   : > { %v3105_v34 = vpop.f32.mrf.mxu1 }
 0x437   : > { %2351 = vrcp.f32 %v3105_v34 }
 0x438   : > { %v1414_v32 = vpop.f32.mrf.mxu1  ;;  %2353 = vrcp.f32 %v3087_v35 }
 0x43a   : > { %v3109_v8 = vpop.f32.mrf.mxu1 }
 0x43b   : > { %2355 = vrcp.f32 %v3109_v8 }
 0x43c   : > { %v1419_v63 = vpop.f32.mrf.mxu1  ;;  %2357 = vrcp.f32 %v3085_v48 }
 0x43e   : > { %v3113_v43 = vpop.f32.mrf.mxu1 }
 0x43f   : > { %2359 = vrcp.f32 %v3113_v43 }
 0x440   : > { %v2348_v14 = vpop.eup %2347  ;;  %v1424_v33 = vpop.f32.mrf.mxu1  ;;  %2361 = vrcp.f32 %v3083_v47 }
 0x441   : > { %1600 = vperm.xlu0 %2217, %v2348_v14   ;;  %v2350_v2 = vpop.eup %2349 }
 0x442   : > { %v3117_v13 = vpop.f32.mrf.mxu1 }
 0x443   : > { %2363 = vrcp.f32 %v3117_v13 }
 0x444   : > { %v2352_v7 = vpop.eup %2351  ;;  %v1429_v45 = vpop.f32.mrf.mxu1  ;;  %2365 = vrcp.f32 %v3081_v52 }
 0x445   : > { %1570 = vperm.xlu0 %2217, %v2350_v2   ;;  %1605 = vperm.xlu1 %2218, %v2352_v7   ;;  %v2354_v0 = vpop.eup %2353  ;;  %2367 = vrcp.f32 %v3079_v46 }
 0x446   : > { %v3120_v51 = vpop.f32.mrf.mxu1 }
 0x448   : > { %v2356_v28 = vpop.eup %2355  ;;  %v1434_v25 = vpop.f32.mrf.mxu1 }
 0x449   : > { %1565 = vperm.xlu0 %2217, %v2354_v0   ;;  %1610 = vperm.xlu1 %2218, %v2356_v28   ;;  %v2358_v20 = vpop.eup %2357 }
 0x44a   : > { %v3123_v39 = vpop.f32.mrf.mxu1 }
 0x44c   : > { %v2360_v5 = vpop.eup %2359  ;;  %v1439_v16 = vpop.f32.mrf.mxu1 }
 0x44d   : > { %1560 = vperm.xlu0 %2217, %v2358_v20   ;;  %1615 = vperm.xlu1 %2218, %v2360_v5   ;;  %v2362_v38 = vpop.eup %2361 }
 0x44e   : > { %v3126_v6 = vpop.f32.mrf.mxu1 }
 0x450   : > { %v2364_v57 = vpop.eup %2363  ;;  %v1444_v4 = vpop.f32.mrf.mxu1 }
 0x451   : > { %1555 = vperm.xlu0 %2217, %v2362_v38   ;;  %1620 = vperm.xlu1 %2218, %v2364_v57   ;;  %v2366_v23 = vpop.eup %2365 }
 0x452   : > { %v3128_v21 = vpop.f32.mrf.mxu1  ;;  %v2368_v26 = vpop.eup %2367 }
 0x454   : > { %v1449_v1 = vpop.f32.mrf.mxu1 }
 0x455   : > { %1550 = vperm.xlu0 %2217, %v2366_v23  }
 0x456   : > { %v3130_v24 = vpop.f32.mrf.mxu1 }
 0x458   : > { %v1454_v27 = vpop.f32.mrf.mxu1 }
 0x459   : > { %1545 = vperm.xlu0 %2217, %v2368_v26  }
 0x45a   : > { %v3132_v22 = vpop.f32.mrf.mxu1 }
 0x45c   : > { %v1459_v18 = vpop.f32.mrf.mxu1 }
 0x45e   : > { %v3134_v61 = vpop.f32.mrf.mxu1  ;;  %v1269_v49 = vpop.f32.mrf.mxu0 }
 0x45f   : > { %2369 = vrcp.f32 %v1269_v49 }
 0x460   : > { %v1464_v62 = vpop.f32.mrf.mxu1  ;;  %v1271_v41 = vpop.f32.mrf.mxu0 }
 0x461   : > { %2371 = vrcp.f32 %v1271_v41 }
 0x462   : > { %v3136_v36 = vpop.f32.mrf.mxu1 }
 0x464   : > { %v1469_v17 = vpop.f32.mrf.mxu1 }
 0x466   : > { %v3138_v53 = vpop.f32.mrf.mxu1 }
 0x468   : > { %v1474_v29 = vpop.f32.mrf.mxu1 }
 0x46a   : > { %v3140_v50 = vpop.f32.mrf.mxu1 }
 0x46c   : > { %v1479_v56 = vpop.f32.mrf.mxu1  ;;  %v2370_v31 = vpop.eup %2369 }
 0x46d   : > { %v1279_v12 = vrot.slane %v2370_v31, %v1278_v59  ;;  %v3178_v31 = vld [vmem:[%s3269_s4] sm:$0xff] }
 0x46e   : > { %v3142_v55 = vpop.f32.mrf.mxu1  ;;  %v2372_v10 = vpop.eup %2371  ;;  %2205 = vmatprep.mubr.msk.f32.mxu1 %vm294_vm0, %v3178_v31 }
 0x46f   : > { %2373 = vrcp.f32 %v3142_v55  ;;  %v1283_v40 = vrot.slane %v2372_v10, %v1278_v59  ;;  %v1284_v14 = vmul.f32 %v1279_v12, %v1269_v49 }
 0x470   : > { %v1484_v3 = vpop.f32.mrf.mxu1 }
 0x471   : > { %v1285_v32 = vmul.f32 %v1283_v40, %v1271_v41 }
 0x472   : > { %v3145_v60 = vpop.f32.mrf.mxu1 }
 0x473   : > { %2375 = vrcp.f32 %v3145_v60  ;;  %1768 = vmatprep.subr.mxu0 %v1285_v32 }
 0x474   : > { %v1489_v15 = vpop.f32.mrf.mxu1  ;;  %1769 = vmatpush1.msra.mxu0 %v1284_v14 }
 0x475   : > { %2133 = vmatmul.mubr.msk.f32.vlgmr.msra.gmra.mxu0 %vm294_vm0, %v3178_v31 }
 0x476   : > { %v3148_v63 = vpop.f32.mrf.mxu1 }
 0x477   : > { %2377 = vrcp.f32 %v3148_v63 }
 0x478   : > { %v1494_v33 = vpop.f32.mrf.mxu1 }
 0x47a   : > { %v3151_v2 = vpop.f32.mrf.mxu1 }
 0x47b   : > { %2379 = vrcp.f32 %v3151_v2 }
 0x47c   : > { %v2374_v7 = vpop.eup %2373  ;;  %v1499_v45 = vpop.f32.mrf.mxu1 }
 0x47d   : > { %1675 = vperm.xlu1 %2218, %v2374_v7  }
 0x47e   : > { %v3154_v0 = vpop.f32.mrf.mxu1 }
 0x47f   : > { %2381 = vrcp.f32 %v3154_v0 }
 0x480   : > { %v2376_v28 = vpop.eup %2375  ;;  %v1504_v25 = vpop.f32.mrf.mxu1 }
 0x481   : > { %1680 = vperm.xlu1 %2218, %v2376_v28  }
 0x482   : > { %v3157_v20 = vpop.f32.mrf.mxu1 }
 0x483   : > { %2383 = vrcp.f32 %v3157_v20 }
 0x484   : > { %v2378_v5 = vpop.eup %2377  ;;  %v1509_v16 = vpop.f32.mrf.mxu1  ;;  %2385 = vrcp.f32 %v3099_v44 }
 0x485   : > { %1685 = vperm.xlu1 %2218, %v2378_v5   ;;  %2387 = vrcp.f32 %v3140_v50 }
 0x486   : > { %2389 = vrcp.f32 %v3097_v11 }
 0x487   : > { %2391 = vrcp.f32 %v3138_v53 }
 0x488   : > { %v2380_v38 = vpop.eup %2379  ;;  %2393 = vrcp.f32 %v3095_v54 }
 0x489   : > { %1690 = vperm.xlu1 %2218, %v2380_v38   ;;  %2395 = vrcp.f32 %v3136_v36 }
 0x48a   : > { %2397 = vrcp.f32 %v3093_v37 }
 0x48b   : > { %2399 = vrcp.f32 %v3134_v61 }
 0x48c   : > { %v2382_v57 = vpop.eup %2381  ;;  %2401 = vrcp.f32 %v3091_v30 }
 0x48d   : > { %1695 = vperm.xlu1 %2218, %v2382_v57   ;;  %2403 = vrcp.f32 %v3132_v22 }
 0x48e   : > { %2405 = vrcp.f32 %v3130_v24 }
 0x48f   : > { %2407 = vrcp.f32 %v3128_v21 }
 0x490   : > { %v2384_v4 = vpop.eup %2383  ;;  %2409 = vrcp.f32 %v3126_v6 }
 0x491   : > { %1700 = vperm.xlu1 %2218, %v2384_v4   ;;  %v2386_v23 = vpop.eup %2385  ;;  %2411 = vrcp.f32 %v3123_v39 }
 0x492   : > { %v2388_v1 = vpop.eup %2387  ;;  %2413 = vrcp.f32 %v3120_v51 }
 0x493   : > { %v2390_v26 = vpop.eup %2389 }
 0x494   : > { %v2392_v27 = vpop.eup %2391 }
 0x495   : > { %1595 = vperm.xlu1 %2218, %v2386_v23   ;;  %v2394_v18 = vpop.eup %2393 }
 0x496   : > { %v2396_v62 = vpop.eup %2395 }
 0x497   : > { %v2398_v49 = vpop.eup %2397 }
 0x498   : > { %v2400_v17 = vpop.eup %2399 }
 0x499   : > { %1670 = vperm.xlu1 %2218, %v2388_v1   ;;  %v2402_v41 = vpop.eup %2401 }
 0x49a   : > { %v2404_v9 = vpop.eup %2403 }
 0x49b   : > { %v2406_v29 = vpop.eup %2405 }
 0x49c   : > { %v2408_v42 = vpop.eup %2407 }
 0x49d   : > { %1590 = vperm.xlu1 %2218, %v2390_v26   ;;  %v2410_v56 = vpop.eup %2409 }
 0x49e   : > { %v2412_v59 = vpop.eup %2411 }
 0x49f   : > { %v2414_v3 = vpop.eup %2413 }
 0x4a1   : > { %1665 = vperm.xlu1 %2218, %v2392_v27  }
 0x4a5   : > { %1585 = vperm.xlu1 %2218, %v2394_v18  }
 0x4a9   : > { %1660 = vperm.xlu1 %2218, %v2396_v62  }
 0x4ad   : > { %1580 = vperm.xlu1 %2218, %v2398_v49  }
 0x4b1   : > { %1655 = vperm.xlu1 %2218, %v2400_v17  }
 0x4b5   : > { %1575 = vperm.xlu1 %2218, %v2402_v41  }
 0x4b9   : > { %1650 = vperm.xlu1 %2218, %v2404_v9  }
 0x4bc   : > { %v1601_v26 = vpop.permute.xlu0 %1600 }
 0x4bd   : > { %1645 = vperm.xlu1 %2218, %v2406_v29   ;;  %v1714_v27 = vmul.f32 %v1601_v26, %v3101_v19 }
 0x4c0   : > { %v1606_v10 = vpop.permute.xlu1 %1605  ;;  %v1571_v49 = vpop.permute.xlu0 %1570 }
 0x4c1   : > { %1640 = vperm.xlu1 %2218, %v2408_v42   ;;  %v1715_v1 = vmul.f32 %v1606_v10, %v3105_v34 }
 0x4c4   : > { %v1611_v12 = vpop.permute.xlu1 %1610 }
 0x4c5   : > { %1635 = vperm.xlu1 %2218, %v2410_v56   ;;  %v1708_v56 = vmul.f32 %v1571_v49, %v3089_v58 }
 0x4c8   : > { %v1616_v40 = vpop.permute.xlu1 %1615 }
 0x4c9   : > { %1630 = vperm.xlu1 %2218, %v2412_v59   ;;  %v1717_v57 = vmul.f32 %v1616_v40, %v3113_v43 }
 0x4cc   : > { %v1621_v15 = vpop.permute.xlu1 %1620 }
 0x4cd   : > { %1625 = vperm.xlu1 %2218, %v2414_v3   ;;  %v1718_v5 = vmul.f32 %v1621_v15, %v3117_v13  ;;  %v1716_v13 = vmul.f32 %v1611_v12, %v3109_v8 }
 0x4f8   : > { %v1676_v32 = vpop.permute.xlu1 %1675 }
 0x4f9   : > { %v1729_v8 = vmul.f32 %v1676_v32, %v3142_v55 }
 0x4fc   : > { %v1681_v14 = vpop.permute.xlu1 %1680 }
 0x4fd   : > { %v1730_v43 = vmul.f32 %v1681_v14, %v3145_v60 }
 0x500   : > { %v1686_v33 = vpop.permute.xlu1 %1685 }
 0x504   : > { %v1691_v7 = vpop.permute.xlu1 %1690 }
 0x505   : > { %v1732_v4 = vmul.f32 %v1691_v7, %v3151_v2 }
 0x508   : > { %v1696_v45 = vpop.permute.xlu1 %1695 }
 0x509   : > { %v1733_v16 = vmul.f32 %v1696_v45, %v3154_v0  ;;  %v1731_v0 = vmul.f32 %v1686_v33, %v3148_v63  ;;  %v2416_v33 = vld [vmem:[%s2480_s26 + $0x8] sm:$0xff]  ;;  %v2417_v45 = vld [vmem:[%s2489_s7] sm:$0xff] }
 0x50c   : > { %v1701_v28 = vpop.permute.xlu1 %1700 }
 0x50d   : > { %v1734_v25 = vmul.f32 %v1701_v28, %v3157_v20 }
 0x50f   : > { %2173 = vmatprep.subr.msk.mxu1 %vm294_vm0, %v1734_v25  ;;  %v2418_v25 = vld [vmem:[%s2489_s7 + $0x8] sm:$0xff] }
 0x510   : > { %2174 = vmatpush3.xpose.msk.msra.mxu1 %vm294_vm0, %v1718_v5  ;;  %v1596_v38 = vpop.permute.xlu1 %1595 }
 0x511   : > { %2175 = vmatprep.subr.msk.mxu1 %vm294_vm0, %v1733_v16  ;;  %v1713_v18 = vmul.f32 %v1596_v38, %v3099_v44 }
 0x514   : > { %2176 = vmatpush3.xpose.msk.msra.mxu1 %vm294_vm0, %v1717_v57  ;;  %v1671_v23 = vpop.permute.xlu1 %1670 }
 0x515   : > { %2177 = vmatprep.subr.msk.mxu1 %vm294_vm0, %v1732_v4  ;;  %v1728_v34 = vmul.f32 %v1671_v23, %v3140_v50 }
 0x518   : > { %2178 = vmatpush3.xpose.msk.msra.mxu1 %vm294_vm0, %v1716_v13  ;;  %v1591_v20 = vpop.permute.xlu1 %1590 }
 0x519   : > { %2179 = vmatprep.subr.msk.mxu1 %vm294_vm0, %v1731_v0  ;;  %v1712_v62 = vmul.f32 %v1591_v20, %v3097_v11  ;;  %v1566_v11 = vpop.permute.xlu0 %1565 }
 0x51a   : > { %v1707_v59 = vmul.f32 %v1566_v11, %v3087_v35 }
 0x51c   : > { %2180 = vmatpush3.xpose.msk.msra.mxu1 %vm294_vm0, %v1715_v1  ;;  %v1666_v2 = vpop.permute.xlu1 %1665 }
 0x51d   : > { %2181 = vmatprep.subr.msk.mxu1 %vm294_vm0, %v1730_v43  ;;  %v1727_v19 = vmul.f32 %v1666_v2, %v3138_v53 }
 0x520   : > { %2182 = vmatpush3.xpose.msk.msra.mxu1 %vm294_vm0, %v1714_v27  ;;  %v1586_v63 = vpop.permute.xlu1 %1585 }
 0x521   : > { %2183 = vmatprep.subr.msk.mxu1 %vm294_vm0, %v1729_v8  ;;  %v1711_v17 = vmul.f32 %v1586_v63, %v3095_v54 }
 0x524   : > { %2184 = vmatpush3.xpose.msk.msra.mxu1 %vm294_vm0, %v1713_v18  ;;  %v1661_v60 = vpop.permute.xlu1 %1660 }
 0x525   : > { %2185 = vmatprep.subr.msk.mxu1 %vm294_vm0, %v1728_v34  ;;  %v1726_v44 = vmul.f32 %v1661_v60, %v3136_v36  ;;  %v1561_v36 = vpop.permute.xlu0 %1560 }
 0x528   : > { %2186 = vmatpush3.xpose.msk.msra.mxu1 %vm294_vm0, %v1712_v62  ;;  %v1581_v55 = vpop.permute.xlu1 %1580 }
 0x529   : > { %2187 = vmatprep.subr.msk.mxu1 %vm294_vm0, %v1727_v19  ;;  %v1710_v41 = vmul.f32 %v1581_v55, %v3093_v37 }
 0x52c   : > { %2188 = vmatpush3.xpose.msk.msra.mxu1 %vm294_vm0, %v1711_v17  ;;  %v1656_v50 = vpop.permute.xlu1 %1655 }
 0x52d   : > { %2189 = vmatprep.subr.msk.mxu1 %vm294_vm0, %v1726_v44  ;;  %v1725_v53 = vmul.f32 %v1656_v50, %v3134_v61 }
 0x530   : > { %2190 = vmatpush3.xpose.msk.msra.mxu1 %vm294_vm0, %v1710_v41  ;;  %v1576_v9 = vpop.permute.xlu1 %1575 }
 0x531   : > { %v1709_v29 = vmul.f32 %v1576_v9, %v3091_v30  ;;  %2191 = vmatprep.subr.msk.mxu1 %vm294_vm0, %v1725_v53  ;;  %v1556_v30 = vpop.permute.xlu0 %1555 }
 0x532   : > { %v1705_v35 = vmul.f32 %v1556_v30, %v3083_v47 }
 0x534   : > { %2192 = vmatpush3.xpose.msk.msra.mxu1 %vm294_vm0, %v1709_v29  ;;  %v1651_v54 = vpop.permute.xlu1 %1650 }
 0x535   : > { %v1724_v42 = vmul.f32 %v1651_v54, %v3132_v22  ;;  %v1706_v22 = vmul.f32 %v1561_v36, %v3085_v48  ;;  %v1551_v12 = vpop.permute.xlu0 %1550 }
 0x536   : > { %v1704_v48 = vmul.f32 %v1551_v12, %v3081_v52  ;;  %v1804_v52 = vpop.f32.mrf.mxu0 }
 0x537   : > { %2193 = vmatprep.subr.msk.mxu1 %vm294_vm0, %v1724_v42 }
 0x538   : > { %2194 = vmatpush3.xpose.msk.msra.mxu1 %vm294_vm0, %v1708_v56  ;;  %v1646_v37 = vpop.permute.xlu1 %1645 }
 0x539   : > { %v1723_v61 = vmul.f32 %v1646_v37, %v3130_v24  ;;  %v1546_v15 = vpop.permute.xlu0 %1545 }
 0x53a   : > { %v1703_v32 = vmul.f32 %v1546_v15, %v3079_v46 }
 0x53b   : > { %2195 = vmatprep.subr.msk.mxu1 %vm294_vm0, %v1723_v61 }
 0x53c   : > { %2196 = vmatpush3.xpose.msk.msra.mxu1 %vm294_vm0, %v1707_v59  ;;  %v1641_v3 = vpop.permute.xlu1 %1640 }
 0x53d   : > { %v1722_v10 = vmul.f32 %v1641_v3, %v3128_v21 }
 0x53f   : > { %2197 = vmatprep.subr.msk.mxu1 %vm294_vm0, %v1722_v10 }
 0x540   : > { %2198 = vmatpush3.xpose.msk.msra.mxu1 %vm294_vm0, %v1706_v22  ;;  %v1636_v58 = vpop.permute.xlu1 %1635 }
 0x541   : > { %v1721_v24 = vmul.f32 %v1636_v58, %v3126_v6 }
 0x543   : > { %2199 = vmatprep.subr.msk.mxu1 %vm294_vm0, %v1721_v24 }
 0x544   : > { %2200 = vmatpush3.xpose.msk.msra.mxu1 %vm294_vm0, %v1705_v35  ;;  %v1631_v40 = vpop.permute.xlu1 %1630 }
 0x545   : > { %v1720_v21 = vmul.f32 %v1631_v40, %v3123_v39  ;;  %v2415_v39 = vld [vmem:[%s2480_s26] sm:$0xff] }
 0x546   : > { %v1976_v14 = vadd.f32 %v2415_v39, %v1804_v52 }
 0x547   : > { %2201 = vmatprep.subr.msk.mxu1 %vm294_vm0, %v1720_v21 }
 0x548   : > { %2202 = vmatpush3.xpose.msk.msra.mxu1 %vm294_vm0, %v1704_v48  ;;  %v1626_v6 = vpop.permute.xlu1 %1625  ;;  %1978 = vst [vmem:[%s279_s18] sm:$0xff] %v1976_v14 }
 0x549   : > { %v1719_v47 = vmul.f32 %v1626_v6, %v3120_v51  ;;  %v1806_v51 = vpop.f32.mrf.mxu0 }
 0x54a   : > { %v1977_v7 = vadd.f32 %v2416_v33, %v1806_v51 }
 0x54b   : > { %2203 = vmatprep.subr.msk.mxu1 %vm294_vm0, %v1719_v47 }
 0x54c   : > { %2204 = vmatpush3.xpose.msk.msra.mxu1 %vm294_vm0, %v1703_v32  ;;  %1979 = vst [vmem:[%s279_s18 + $0x8] sm:$0xff] %v1977_v7 }
 0x54f   : > { %2206 = vmatmul.mubr.msk.f32.vlgmr.msra.gmra.mxu1 %vm294_vm0, %v3178_v31 }
 0x60f   : > { %v1971_v46 = vpop.f32.mrf.mxu1 }
 0x610   : > { %v1980_v31 = vadd.f32 %v2417_v45, %v1971_v46 }
 0x611   : > { %v1973_v28 = vpop.f32.mrf.mxu1 }
 0x612   : > { %1982 = vst [vmem:[%s284_s22] sm:$0xff] %v1980_v31  ;;  %v1981_v5 = vadd.f32 %v2418_v25, %v1973_v28 }
 0x614   : > { %1983 = vst [vmem:[%s284_s22 + $0x8] sm:$0xff] %v1981_v5 }
 0x615 PF: > { %s17_s21 = sadd.s32 1, %s2425_s21  }
 0x616   : > { %p14_p4 = scmp.ge.s32.totalorder %s17_s21, 4  }
 0x618   :  { %16 = sbr.rel (!%p14_p4) target bundleno = 1 (0x1), region = 85 }

</bundles_post_ra>
